<compile_context>
chip_gen: v6e
topology: v6e:2x2x1
jax: 0.10.0
libtpu: 0.0.40
codegen_flags: <defaults>
</compile_context>

<pallas_src>
import functools
import re

import jax
import jax.numpy as jnp
from jax.experimental import pallas as pl
from jax.experimental.pallas import tpu as pltpu

EPS = 1e-5  # PyTorch nn.LayerNorm default eps


# --------------------------------------------------------------------------
# Kernel
# --------------------------------------------------------------------------
def _mixer_kernel(x_ref,
                  g1_ref, b1_ref,          # LayerNorm 1: (1, C), (1, C)  f32
                  ws0_ref, bs0_ref,        # token MLP layer0: (S, S) bf16, (S, 1) f32
                  ws1_ref, bs1_ref,        # token MLP layer1: (S, S) bf16, (S, 1) f32
                  g2_ref, b2_ref,          # LayerNorm 2: (1, C), (1, C)  f32
                  wc0t_ref, bc0_ref,       # channel MLP layer0: (C, C) bf16 (pre-T), (1, C) f32
                  wc1t_ref, bc1_ref,       # channel MLP layer1: (C, C) bf16 (pre-T), (1, C) f32
                  o_ref, *, slope, ew_dtype):
    bt, S, C = x_ref.shape                 # static block shape: (Bt, S, C)
    bf16 = jnp.bfloat16
    x = x_ref[...]                         # (Bt, S, C) f32

    def layer_norm(v, g, b):
        # two-pass stats (matches PyTorch; var >= 0 by construction).
        mu = jnp.mean(v, axis=-1, keepdims=True)
        d = v - mu
        var = jnp.mean(d * d, axis=-1, keepdims=True)
        nrm = (d * jax.lax.rsqrt(var + EPS)).astype(ew_dtype)
        # affine in ew_dtype (bf16 on v6e/v7x, f32 on v5e); output is the
        # bf16 MXU operand either way.
        return (nrm * g.astype(ew_dtype) + b.astype(ew_dtype)).astype(bf16)

    def leaky(v):
        return jnp.where(v >= 0, v, slope * v)

    # ---- LayerNorm 1 over channel dim ------------------------------------
    y1 = layer_norm(x, g1_ref[...], b1_ref[...])                     # (Bt,S,C) bf16

    # ---- Token-mixing MLP: Linear(S,S) -> LeakyReLU -> [dropout] -> Linear(S,S)
    # PyTorch applies the Linear on x.transpose(1,2); in (S, C) layout that is
    # W @ y, i.e. a single batched contraction over S (weight shared across Bt).
    ws0 = jnp.broadcast_to(ws0_ref[...], (bt, S, S))                 # bf16
    ws1 = jnp.broadcast_to(ws1_ref[...], (bt, S, S))                 # bf16
    h = jnp.einsum('bts,bsc->btc', ws0, y1,
                   preferred_element_type=jnp.float32)               # f32 acc
    h = leaky(h.astype(ew_dtype) + bs0_ref[...].astype(ew_dtype)).astype(bf16)
    x1 = jnp.einsum('bts,bsc->btc', ws1, h,
                    preferred_element_type=jnp.float32)              # f32 acc

    # residual 1 (f32; final-layer bias folded into the residual add)
    x2 = (x1 + bs1_ref[...]) + x                                     # (Bt,S,C) f32

    # ---- LayerNorm 2 + channel-mixing MLP: Linear(C,C) -> LeakyReLU -> Linear(C,C)
    # Channel weights arrive pre-transposed -> plain row-major 2-D matmuls.
    n = bt * S
    x2_2d = x2.reshape(n, C)                                         # layout-free
    y2 = layer_norm(x2_2d, g2_ref[...], b2_ref[...])                 # (n,C) bf16
    h2 = jnp.dot(y2, wc0t_ref[...], preferred_element_type=jnp.float32)
    h2 = leaky(h2.astype(ew_dtype) + bc0_ref[...].astype(ew_dtype)).astype(bf16)
    x3 = jnp.dot(h2, wc1t_ref[...], preferred_element_type=jnp.float32) + bc1_ref[...]

    # residual 2 (f32), lane-dense store (C multiple of 128 in practice)
    o_ref[...] = (x3 + x2_2d).reshape(bt, S, C).astype(o_ref.dtype)


# --------------------------------------------------------------------------
# Chip-aware sizing helpers
# --------------------------------------------------------------------------
def _tpu_topology():
    """Best-effort (generation, per-core VMEM bytes, # TensorCores/chip)."""
    gen = 0
    try:
        kind = jax.devices()[0].device_kind          # e.g. "TPU v6e", "TPU7x"
        m = re.search(r"(\d+)", kind)
        if m:
            gen = int(m.group(1))
    except Exception:
        pass
    vmem_cap = (128 << 20) if gen in (4, 5, 6) else (64 << 20)   # conservative default
    num_tc = 2 if gen >= 7 else 1
    try:
        info = pltpu.get_tpu_info()
        cap = getattr(info, "vmem_capacity_bytes", None)
        if isinstance(cap, int) and cap > 0:
            vmem_cap = cap
        for name in ("num_cores", "core_count", "num_tensorcores", "tensorcore_count"):
            v = getattr(info, name, None)
            if isinstance(v, int) and v > 0:
                num_tc = v
                break
    except Exception:
        pass
    return gen, vmem_cap, num_tc


def _param_bytes(S, C, double_buffered):
    """VMEM footprint of the resident parameters (with layout padding)."""
    w = (2 * S * S + 2 * C * C) * 2                               # bf16 weights
    b = (2 * max(S, 8) * 128 + 6 * 8 * max(C, 128)) * 4           # padded f32 vectors
    return (2 if double_buffered else 1) * (w + b)


def _pick_batch_block(B, S, C, vmem_cap, param_bytes, num_tc):
    """Largest batch block that fits VMEM; targets bt*S >= 256 MXU rows.
    Keeps >= num_tc grid steps only on multi-TC chips and only when that still
    allows >= 256 rows (single-TC chips: the grid is a serial loop, so bigger
    blocks always win)."""
    slab = S * C * 4                                              # one f32 (1,S,C) slab
    budget = max(vmem_cap - param_bytes - (8 << 20), 4 << 20)
    per_slab = budget // 10       # 2x2 in/out double buffers + ~6 live f32 temps
    divs = [d for d in range(1, B + 1) if B % d == 0 and d * slab <= per_slab]
    if not divs:
        divs = [1]
    best = max(divs)
    if num_tc >= 2:
        multi = [d for d in divs if B // d >= num_tc]
        if multi and (max(multi) * S >= 256 or max(multi) == best):
            best = max(multi)
    return best


# --------------------------------------------------------------------------
# Wrapper
# --------------------------------------------------------------------------
def _call(x, params, *, slope, ew_dtype, bt, single_buffer_params,
          vmem_cap, param_bytes, donate_input):
    B, S, C = x.shape
    grid = (B // bt,)
    kernel = functools.partial(_mixer_kernel, slope=slope, ew_dtype=ew_dtype)

    # Pre-transpose channel-MLP weights ONCE, outside the kernel.
    wc0t = params["wc0"].T
    wc1t = params["wc1"].T

    def param_spec(shape):
        # Constant index_map -> block never changes; single-buffer it so the
        # weights are resident once in VMEM instead of double-buffered.
        if single_buffer_params:
            return pl.BlockSpec(shape, lambda b: (0, 0),
                                pipeline_mode=pl.Buffered(1))
        return pl.BlockSpec(shape, lambda b: (0, 0))

    in_specs = [
        pl.BlockSpec((bt, S, C), lambda b: (b, 0, 0)),     # x block
        param_spec((1, C)), param_spec((1, C)),            # LN1 gamma/beta
        param_spec((S, S)), param_spec((S, 1)),            # token MLP layer 0
        param_spec((S, S)), param_spec((S, 1)),            # token MLP layer 1
        param_spec((1, C)), param_spec((1, C)),            # LN2 gamma/beta
        param_spec((C, C)), param_spec((1, C)),            # channel MLP layer 0 (W.T)
        param_spec((C, C)), param_spec((1, C)),            # channel MLP layer 1 (W.T)
    ]

    # VMEM limit derived from the actual footprint, clamped to real capacity.
    slab = bt * S * C * 4
    needed = param_bytes + 10 * slab
    ceiling = max(vmem_cap - (8 << 20), 32 << 20)
    vmem_limit = int(min(max(needed + (4 << 20), 32 << 20), ceiling))

    return pl.pallas_call(
        kernel,
        out_shape=jax.ShapeDtypeStruct((B, S, C), x.dtype),
        grid_spec=pltpu.PrefetchScalarGridSpec(
            num_scalar_prefetch=0,
            grid=grid,
            in_specs=in_specs,
            out_specs=pl.BlockSpec((bt, S, C), lambda b: (b, 0, 0)),
        ),
        input_output_aliases={0: 0} if donate_input else {},
        compiler_params=pltpu.CompilerParams(
            dimension_semantics=("parallel",),
            vmem_limit_bytes=vmem_limit),
    )(x,
      params["g1"], params["b1"],
      params["ws0"], params["bs0"], params["ws1"], params["bs1"],
      params["g2"], params["b2"],
      wc0t, params["bc0"], wc1t, params["bc1"])


def mlp_mixer_layer(x, params, *, slope=0.2, batch_block=None, donate_input=True):
    """x: (B, S, C) float32.  params: dict of arrays (see init_params).

    WARNING: donate_input=True aliases x's buffer to the output
    (input_output_aliases={0: 0}); do not read x after this call."""
    B, S, C = x.shape
    gen, vmem_cap, num_tc = _tpu_topology()
    ew_dtype = jnp.bfloat16 if gen >= 6 else jnp.float32   # bf16 VALU on v6e/v7x

    last_err = None
    for single in (True, False):                           # fallback if Buffered(1) rejected
        pbytes = _param_bytes(S, C, double_buffered=not single)
        bt = (batch_block if batch_block is not None
              else _pick_batch_block(B, S, C, vmem_cap, pbytes, num_tc))
        assert B % bt == 0, "batch must be divisible by batch_block"  # TODO(synk): tail path
        try:
            return _call(x, params, slope=slope, ew_dtype=ew_dtype, bt=bt,
                         single_buffer_params=single, vmem_cap=vmem_cap,
                         param_bytes=pbytes, donate_input=donate_input)
        except Exception as e:
            last_err = e
    raise last_err


# --------------------------------------------------------------------------
# Parameters + plain-JAX reference (mirrors kernel numerics)
# --------------------------------------------------------------------------
def init_params(key, seq_len, channel_dim):
    """Deterministic init mirroring the PyTorch module: kaiming_normal_
    (std = sqrt(2/fan_in)) for linear weights, zero biases, LayerNorm gamma=1 /
    beta=0.  Matmul weights are shipped in bf16 (f32 accumulation in-kernel)."""
    ks = jax.random.split(key, 4)
    S, C = seq_len, channel_dim

    def kaiming(k, out_d, in_d):
        w = jax.random.normal(k, (out_d, in_d), jnp.float32) * jnp.sqrt(2.0 / in_d)
        return w.astype(jnp.bfloat16)

    return {
        "g1": jnp.ones((1, C), jnp.float32),
        "b1": jnp.zeros((1, C), jnp.float32),
        "ws0": kaiming(ks[0], S, S),
        "bs0": jnp.zeros((S, 1), jnp.float32),
        "ws1": kaiming(ks[1], S, S),
        "bs1": jnp.zeros((S, 1), jnp.float32),
        "g2": jnp.ones((1, C), jnp.float32),
        "b2": jnp.zeros((1, C), jnp.float32),
        "wc0": kaiming(ks[2], C, C),
        "bc0": jnp.zeros((1, C), jnp.float32),
        "wc1": kaiming(ks[3], C, C),
        "bc1": jnp.zeros((1, C), jnp.float32),
    }


def _reference(x, p, slope=0.2, ew_dtype=jnp.float32):
    """Plain-JAX reference with the SAME numerics as the kernel (bf16 matmul
    operands, f32 stats/accumulation/residuals, ew_dtype element-wise tail)."""
    bf16 = jnp.bfloat16

    def ln(v, g, b):
        mu = jnp.mean(v, -1, keepdims=True)
        d = v - mu
        var = jnp.mean(d * d, -1, keepdims=True)
        nrm = (d * jax.lax.rsqrt(var + EPS)).astype(ew_dtype)
        return (nrm * g.astype(ew_dtype) + b.astype(ew_dtype)).astype(bf16)

    def lrelu(v):
        return jnp.where(v >= 0, v, slope * v)

    y1 = ln(x, p["g1"], p["b1"])
    h = jnp.einsum("ts,bsc->btc", p["ws0"], y1, preferred_element_type=jnp.float32)
    h = lrelu(h.astype(ew_dtype) + p["bs0"].astype(ew_dtype)).astype(bf16)
    x1 = jnp.einsum("ts,bsc->btc", p["ws1"], h, preferred_element_type=jnp.float32)
    x2 = (x1 + p["bs1"]) + x
    y2 = ln(x2, p["g2"], p["b2"])
    h2 = jnp.einsum("bsc,dc->bsd", y2, p["wc0"], preferred_element_type=jnp.float32)
    h2 = lrelu(h2.astype(ew_dtype) + p["bc0"].astype(ew_dtype)).astype(bf16)
    x3 = jnp.einsum("bsc,dc->bsd", h2, p["wc1"], preferred_element_type=jnp.float32) + p["bc1"]
    return x3 + x2


# --------------------------------------------------------------------------
# Demo
# --------------------------------------------------------------------------
if __name__ == "__main__":
    # batch, seq_len, channel_dim.  C multiple of 128 -> lane-dense stores.
    # (Toy shape: overhead-dominated; tune/benchmark on production shapes.)
    B, S, C = 4, 16, 128
    key = jax.random.PRNGKey(0)
    kx, kp = jax.random.split(key)
    x = jax.random.normal(kx, (B, S, C), jnp.float32)
    params = init_params(kp, S, C)

    gen, _, _ = _tpu_topology()
    ew_dtype = jnp.bfloat16 if gen >= 6 else jnp.float32

    # Compute the reference BEFORE the kernel call: the kernel donates x's
    # buffer to its output (input_output_aliases).
    ref = jax.block_until_ready(_reference(x, params, slope=0.2, ew_dtype=ew_dtype))

    out = jax.block_until_ready(mlp_mixer_layer(x, params, slope=0.2))

    assert out.shape == (B, S, C)
    # Same bf16 operands / ew_dtype in kernel and reference -> tolerance covers
    # accumulation-order / rounding-boundary differences only.
    assert jnp.allclose(out, ref, atol=3e-2, rtol=3e-2), "mismatch vs reference"
    print("KERNEL_OK")
</pallas_src>

<mosaic_0001>
module attributes {stable_mosaic.version = 11 : i64} {
  func.func @_mixer_kernel(%arg0: i32, %arg1: memref<4x16x128xf32, #tpu.memory_space<vmem>>, %arg2: memref<1x128xf32, #tpu.memory_space<vmem>>, %arg3: memref<1x128xf32, #tpu.memory_space<vmem>>, %arg4: memref<16x16xbf16, #tpu.memory_space<vmem>>, %arg5: memref<16x1xf32, #tpu.memory_space<vmem>>, %arg6: memref<16x16xbf16, #tpu.memory_space<vmem>>, %arg7: memref<16x1xf32, #tpu.memory_space<vmem>>, %arg8: memref<1x128xf32, #tpu.memory_space<vmem>>, %arg9: memref<1x128xf32, #tpu.memory_space<vmem>>, %arg10: memref<128x128xbf16, #tpu.memory_space<vmem>>, %arg11: memref<1x128xf32, #tpu.memory_space<vmem>>, %arg12: memref<128x128xbf16, #tpu.memory_space<vmem>>, %arg13: memref<1x128xf32, #tpu.memory_space<vmem>>, %arg14: memref<4x16x128xf32, #tpu.memory_space<vmem>>) attributes {dimension_semantics = [#tpu.dimension_semantics<parallel>], iteration_bounds = array<i64: 1>, scalar_prefetch = 0 : i64, scratch_operands = 0 : i64, tpu.core_type = #tpu.core_type<tc>, window_params = [{transform_indices = @transform_0, window_bounds = array<i64: 4, 16, 128>}, {pipeline_mode = #tpu.pipeline_mode<synchronous>, transform_indices = @transform_1, window_bounds = array<i64: 1, 128>}, {pipeline_mode = #tpu.pipeline_mode<synchronous>, transform_indices = @transform_2, window_bounds = array<i64: 1, 128>}, {pipeline_mode = #tpu.pipeline_mode<synchronous>, transform_indices = @transform_3, window_bounds = array<i64: 16, 16>}, {pipeline_mode = #tpu.pipeline_mode<synchronous>, transform_indices = @transform_4, window_bounds = array<i64: 16, 1>}, {pipeline_mode = #tpu.pipeline_mode<synchronous>, transform_indices = @transform_5, window_bounds = array<i64: 16, 16>}, {pipeline_mode = #tpu.pipeline_mode<synchronous>, transform_indices = @transform_6, window_bounds = array<i64: 16, 1>}, {pipeline_mode = #tpu.pipeline_mode<synchronous>, transform_indices = @transform_7, window_bounds = array<i64: 1, 128>}, {pipeline_mode = #tpu.pipeline_mode<synchronous>, transform_indices = @transform_8, window_bounds = array<i64: 1, 128>}, {pipeline_mode = #tpu.pipeline_mode<synchronous>, transform_indices = @transform_9, window_bounds = array<i64: 128, 128>}, {pipeline_mode = #tpu.pipeline_mode<synchronous>, transform_indices = @transform_10, window_bounds = array<i64: 1, 128>}, {pipeline_mode = #tpu.pipeline_mode<synchronous>, transform_indices = @transform_11, window_bounds = array<i64: 128, 128>}, {pipeline_mode = #tpu.pipeline_mode<synchronous>, transform_indices = @transform_12, window_bounds = array<i64: 1, 128>}, {transform_indices = @transform_13, window_bounds = array<i64: 4, 16, 128>}]} {
    %c0 = arith.constant 0 : index
    %c0_0 = arith.constant 0 : index
    %c0_1 = arith.constant 0 : index
    %0 = vector.load %arg1[%c0, %c0_0, %c0_1] : memref<4x16x128xf32, #tpu.memory_space<vmem>>, vector<4x16x128xf32>
    %c0_2 = arith.constant 0 : index
    %c0_3 = arith.constant 0 : index
    %1 = vector.load %arg2[%c0_2, %c0_3] : memref<1x128xf32, #tpu.memory_space<vmem>>, vector<1x128xf32>
    %c0_4 = arith.constant 0 : index
    %c0_5 = arith.constant 0 : index
    %2 = vector.load %arg3[%c0_4, %c0_5] : memref<1x128xf32, #tpu.memory_space<vmem>>, vector<1x128xf32>
    %cst = arith.constant dense<0.000000e+00> : vector<4x16xf32>
    %3 = vector.multi_reduction <add>, %0, %cst [2] : vector<4x16x128xf32> to vector<4x16xf32>
    %4 = vector.shape_cast %3 : vector<4x16xf32> to vector<4x16x1xf32>
    %cst_6 = arith.constant 1.280000e+02 : f32
    %5 = vector.broadcast %cst_6 : f32 to vector<4x16x1xf32>
    %6 = arith.divf %4, %5 : vector<4x16x1xf32>
    %7 = vector.broadcast %6 : vector<4x16x1xf32> to vector<4x16x128xf32>
    %8 = arith.subf %0, %7 : vector<4x16x128xf32>
    %9 = arith.mulf %8, %8 : vector<4x16x128xf32>
    %cst_7 = arith.constant dense<0.000000e+00> : vector<4x16xf32>
    %10 = vector.multi_reduction <add>, %9, %cst_7 [2] : vector<4x16x128xf32> to vector<4x16xf32>
    %11 = vector.shape_cast %10 : vector<4x16xf32> to vector<4x16x1xf32>
    %cst_8 = arith.constant 1.280000e+02 : f32
    %12 = vector.broadcast %cst_8 : f32 to vector<4x16x1xf32>
    %13 = arith.divf %11, %12 : vector<4x16x1xf32>
    %cst_9 = arith.constant 9.99999974E-6 : f32
    %14 = vector.broadcast %cst_9 : f32 to vector<4x16x1xf32>
    %15 = arith.addf %13, %14 : vector<4x16x1xf32>
    %16 = math.rsqrt %15 : vector<4x16x1xf32>
    %17 = vector.broadcast %16 : vector<4x16x1xf32> to vector<4x16x128xf32>
    %18 = arith.mulf %8, %17 : vector<4x16x128xf32>
    %19 = vector.shape_cast %1 : vector<1x128xf32> to vector<1x1x128xf32>
    %20 = vector.broadcast %19 : vector<1x1x128xf32> to vector<4x16x128xf32>
    %21 = arith.mulf %18, %20 : vector<4x16x128xf32>
    %22 = vector.shape_cast %2 : vector<1x128xf32> to vector<1x1x128xf32>
    %23 = vector.broadcast %22 : vector<1x1x128xf32> to vector<4x16x128xf32>
    %24 = arith.addf %21, %23 : vector<4x16x128xf32>
    %25 = arith.truncf %24 : vector<4x16x128xf32> to vector<4x16x128xbf16>
    %c0_10 = arith.constant 0 : index
    %c0_11 = arith.constant 0 : index
    %26 = vector.load %arg4[%c0_10, %c0_11] : memref<16x16xbf16, #tpu.memory_space<vmem>>, vector<16x16xbf16>
    %27 = vector.shape_cast %26 : vector<16x16xbf16> to vector<1x16x16xbf16>
    %28 = vector.broadcast %27 : vector<1x16x16xbf16> to vector<4x16x16xbf16>
    %c0_12 = arith.constant 0 : index
    %c0_13 = arith.constant 0 : index
    %29 = vector.load %arg6[%c0_12, %c0_13] : memref<16x16xbf16, #tpu.memory_space<vmem>>, vector<16x16xbf16>
    %30 = vector.shape_cast %29 : vector<16x16xbf16> to vector<1x16x16xbf16>
    %31 = vector.broadcast %30 : vector<1x16x16xbf16> to vector<4x16x16xbf16>
    "tpu.trace_start"() <{level = 10 : i32, message = "bts,bsc->btc"}> : () -> ()
    %cst_14 = arith.constant dense<0.000000e+00> : vector<4x16x128xf32>
    %32 = tpu.matmul %28, %25, %cst_14 {dimension_numbers = #tpu.dot_dimension_numbers<[2], [1], [1], [2], [0, 0, 0, 1, 1, 2], [0], [0]>} : vector<4x16x16xbf16>, vector<4x16x128xbf16>, vector<4x16x128xf32> -> vector<4x16x128xf32>
    "tpu.trace_stop"() : () -> ()
    %c0_15 = arith.constant 0 : index
    %c0_16 = arith.constant 0 : index
    %33 = vector.load %arg5[%c0_15, %c0_16] : memref<16x1xf32, #tpu.memory_space<vmem>>, vector<16x1xf32>
    %34 = vector.shape_cast %33 : vector<16x1xf32> to vector<1x16x1xf32>
    %35 = vector.broadcast %34 : vector<1x16x1xf32> to vector<4x16x128xf32>
    %36 = arith.addf %32, %35 : vector<4x16x128xf32>
    %cst_17 = arith.constant 0.000000e+00 : f32
    %37 = vector.broadcast %cst_17 : f32 to vector<4x16x128xf32>
    %38 = arith.cmpf oge, %36, %37 : vector<4x16x128xf32>
    %cst_18 = arith.constant 2.000000e-01 : f32
    %39 = vector.broadcast %cst_18 : f32 to vector<4x16x128xf32>
    %40 = arith.mulf %39, %36 : vector<4x16x128xf32>
    %41 = arith.select %38, %36, %40 : vector<4x16x128xi1>, vector<4x16x128xf32>
    %42 = arith.truncf %41 : vector<4x16x128xf32> to vector<4x16x128xbf16>
    "tpu.trace_start"() <{level = 10 : i32, message = "bts,bsc->btc"}> : () -> ()
    %cst_19 = arith.constant dense<0.000000e+00> : vector<4x16x128xf32>
    %43 = tpu.matmul %31, %42, %cst_19 {dimension_numbers = #tpu.dot_dimension_numbers<[2], [1], [1], [2], [0, 0, 0, 1, 1, 2], [0], [0]>} : vector<4x16x16xbf16>, vector<4x16x128xbf16>, vector<4x16x128xf32> -> vector<4x16x128xf32>
    "tpu.trace_stop"() : () -> ()
    %c0_20 = arith.constant 0 : index
    %c0_21 = arith.constant 0 : index
    %44 = vector.load %arg7[%c0_20, %c0_21] : memref<16x1xf32, #tpu.memory_space<vmem>>, vector<16x1xf32>
    %45 = vector.shape_cast %44 : vector<16x1xf32> to vector<1x16x1xf32>
    %46 = vector.broadcast %45 : vector<1x16x1xf32> to vector<4x16x128xf32>
    %47 = arith.addf %43, %46 : vector<4x16x128xf32>
    %48 = arith.addf %47, %0 : vector<4x16x128xf32>
    %49 = vector.shape_cast %48 : vector<4x16x128xf32> to vector<64x128xf32>
    %c0_22 = arith.constant 0 : index
    %c0_23 = arith.constant 0 : index
    %50 = vector.load %arg8[%c0_22, %c0_23] : memref<1x128xf32, #tpu.memory_space<vmem>>, vector<1x128xf32>
    %c0_24 = arith.constant 0 : index
    %c0_25 = arith.constant 0 : index
    %51 = vector.load %arg9[%c0_24, %c0_25] : memref<1x128xf32, #tpu.memory_space<vmem>>, vector<1x128xf32>
    %cst_26 = arith.constant dense<0.000000e+00> : vector<64xf32>
    %52 = vector.multi_reduction <add>, %49, %cst_26 [1] : vector<64x128xf32> to vector<64xf32>
    %53 = vector.shape_cast %52 : vector<64xf32> to vector<64x1xf32>
    %cst_27 = arith.constant 1.280000e+02 : f32
    %54 = vector.broadcast %cst_27 : f32 to vector<64x1xf32>
    %55 = arith.divf %53, %54 : vector<64x1xf32>
    %56 = vector.broadcast %55 : vector<64x1xf32> to vector<64x128xf32>
    %57 = arith.subf %49, %56 : vector<64x128xf32>
    %58 = arith.mulf %57, %57 : vector<64x128xf32>
    %cst_28 = arith.constant dense<0.000000e+00> : vector<64xf32>
    %59 = vector.multi_reduction <add>, %58, %cst_28 [1] : vector<64x128xf32> to vector<64xf32>
    %60 = vector.shape_cast %59 : vector<64xf32> to vector<64x1xf32>
    %cst_29 = arith.constant 1.280000e+02 : f32
    %61 = vector.broadcast %cst_29 : f32 to vector<64x1xf32>
    %62 = arith.divf %60, %61 : vector<64x1xf32>
    %cst_30 = arith.constant 9.99999974E-6 : f32
    %63 = vector.broadcast %cst_30 : f32 to vector<64x1xf32>
    %64 = arith.addf %62, %63 : vector<64x1xf32>
    %65 = math.rsqrt %64 : vector<64x1xf32>
    %66 = vector.broadcast %65 : vector<64x1xf32> to vector<64x128xf32>
    %67 = arith.mulf %57, %66 : vector<64x128xf32>
    %68 = vector.broadcast %50 : vector<1x128xf32> to vector<64x128xf32>
    %69 = arith.mulf %67, %68 : vector<64x128xf32>
    %70 = vector.broadcast %51 : vector<1x128xf32> to vector<64x128xf32>
    %71 = arith.addf %69, %70 : vector<64x128xf32>
    %72 = arith.truncf %71 : vector<64x128xf32> to vector<64x128xbf16>
    %c0_31 = arith.constant 0 : index
    %c0_32 = arith.constant 0 : index
    %73 = vector.load %arg10[%c0_31, %c0_32] : memref<128x128xbf16, #tpu.memory_space<vmem>>, vector<128x128xbf16>
    %cst_33 = arith.constant dense<0.000000e+00> : vector<64x128xf32>
    %74 = tpu.matmul %72, %73, %cst_33 {dimension_numbers = #tpu.dot_dimension_numbers<[1], [0], [0], [1], [0, 0, 1, 1], [], []>} : vector<64x128xbf16>, vector<128x128xbf16>, vector<64x128xf32> -> vector<64x128xf32>
    %c0_34 = arith.constant 0 : index
    %c0_35 = arith.constant 0 : index
    %75 = vector.load %arg11[%c0_34, %c0_35] : memref<1x128xf32, #tpu.memory_space<vmem>>, vector<1x128xf32>
    %76 = vector.broadcast %75 : vector<1x128xf32> to vector<64x128xf32>
    %77 = arith.addf %74, %76 : vector<64x128xf32>
    %cst_36 = arith.constant 0.000000e+00 : f32
    %78 = vector.broadcast %cst_36 : f32 to vector<64x128xf32>
    %79 = arith.cmpf oge, %77, %78 : vector<64x128xf32>
    %cst_37 = arith.constant 2.000000e-01 : f32
    %80 = vector.broadcast %cst_37 : f32 to vector<64x128xf32>
    %81 = arith.mulf %80, %77 : vector<64x128xf32>
    %82 = arith.select %79, %77, %81 : vector<64x128xi1>, vector<64x128xf32>
    %83 = arith.truncf %82 : vector<64x128xf32> to vector<64x128xbf16>
    %c0_38 = arith.constant 0 : index
    %c0_39 = arith.constant 0 : index
    %84 = vector.load %arg12[%c0_38, %c0_39] : memref<128x128xbf16, #tpu.memory_space<vmem>>, vector<128x128xbf16>
    %cst_40 = arith.constant dense<0.000000e+00> : vector<64x128xf32>
    %85 = tpu.matmul %83, %84, %cst_40 {dimension_numbers = #tpu.dot_dimension_numbers<[1], [0], [0], [1], [0, 0, 1, 1], [], []>} : vector<64x128xbf16>, vector<128x128xbf16>, vector<64x128xf32> -> vector<64x128xf32>
    %c0_41 = arith.constant 0 : index
    %c0_42 = arith.constant 0 : index
    %86 = vector.load %arg13[%c0_41, %c0_42] : memref<1x128xf32, #tpu.memory_space<vmem>>, vector<1x128xf32>
    %87 = vector.broadcast %86 : vector<1x128xf32> to vector<64x128xf32>
    %88 = arith.addf %85, %87 : vector<64x128xf32>
    %89 = arith.addf %88, %49 : vector<64x128xf32>
    %90 = vector.shape_cast %89 : vector<64x128xf32> to vector<4x16x128xf32>
    %c0_43 = arith.constant 0 : index
    %c0_44 = arith.constant 0 : index
    %c0_45 = arith.constant 0 : index
    %91 = vector.load %arg14[%c0_43, %c0_44, %c0_45] : memref<4x16x128xf32, #tpu.memory_space<vmem>>, vector<4x16x128xf32>
    tpu.vector_store %arg14[%c0_43, %c0_44, %c0_45], %90 {strides = array<i32>} : memref<4x16x128xf32, #tpu.memory_space<vmem>>, vector<4x16x128xf32>,
    return
  }
  func.func @transform_0(%arg0: i32) -> (i32, i32, i32) {
    %c0_i32 = arith.constant 0 : i32
    %c0_i32_0 = arith.constant 0 : i32
    %c0_i32_1 = arith.constant 0 : i32
    return %arg0, %c0_i32, %c0_i32_0 : i32, i32, i32
  }
  func.func @transform_1(%arg0: i32) -> (i32, i32) {
    %c0_i32 = arith.constant 0 : i32
    %c0_i32_0 = arith.constant 0 : i32
    %c0_i32_1 = arith.constant 0 : i32
    return %c0_i32, %c0_i32_0 : i32, i32
  }
  func.func @transform_2(%arg0: i32) -> (i32, i32) {
    %c0_i32 = arith.constant 0 : i32
    %c0_i32_0 = arith.constant 0 : i32
    %c0_i32_1 = arith.constant 0 : i32
    return %c0_i32, %c0_i32_0 : i32, i32
  }
  func.func @transform_3(%arg0: i32) -> (i32, i32) {
    %c0_i32 = arith.constant 0 : i32
    %c0_i32_0 = arith.constant 0 : i32
    %c0_i32_1 = arith.constant 0 : i32
    return %c0_i32, %c0_i32_0 : i32, i32
  }
  func.func @transform_4(%arg0: i32) -> (i32, i32) {
    %c0_i32 = arith.constant 0 : i32
    %c0_i32_0 = arith.constant 0 : i32
    %c0_i32_1 = arith.constant 0 : i32
    return %c0_i32, %c0_i32_0 : i32, i32
  }
  func.func @transform_5(%arg0: i32) -> (i32, i32) {
    %c0_i32 = arith.constant 0 : i32
    %c0_i32_0 = arith.constant 0 : i32
    %c0_i32_1 = arith.constant 0 : i32
    return %c0_i32, %c0_i32_0 : i32, i32
  }
  func.func @transform_6(%arg0: i32) -> (i32, i32) {
    %c0_i32 = arith.constant 0 : i32
    %c0_i32_0 = arith.constant 0 : i32
    %c0_i32_1 = arith.constant 0 : i32
    return %c0_i32, %c0_i32_0 : i32, i32
  }
  func.func @transform_7(%arg0: i32) -> (i32, i32) {
    %c0_i32 = arith.constant 0 : i32
    %c0_i32_0 = arith.constant 0 : i32
    %c0_i32_1 = arith.constant 0 : i32
    return %c0_i32, %c0_i32_0 : i32, i32
  }
  func.func @transform_8(%arg0: i32) -> (i32, i32) {
    %c0_i32 = arith.constant 0 : i32
    %c0_i32_0 = arith.constant 0 : i32
    %c0_i32_1 = arith.constant 0 : i32
    return %c0_i32, %c0_i32_0 : i32, i32
  }
  func.func @transform_9(%arg0: i32) -> (i32, i32) {
    %c0_i32 = arith.constant 0 : i32
    %c0_i32_0 = arith.constant 0 : i32
    %c0_i32_1 = arith.constant 0 : i32
    return %c0_i32, %c0_i32_0 : i32, i32
  }
  func.func @transform_10(%arg0: i32) -> (i32, i32) {
    %c0_i32 = arith.constant 0 : i32
    %c0_i32_0 = arith.constant 0 : i32
    %c0_i32_1 = arith.constant 0 : i32
    return %c0_i32, %c0_i32_0 : i32, i32
  }
  func.func @transform_11(%arg0: i32) -> (i32, i32) {
    %c0_i32 = arith.constant 0 : i32
    %c0_i32_0 = arith.constant 0 : i32
    %c0_i32_1 = arith.constant 0 : i32
    return %c0_i32, %c0_i32_0 : i32, i32
  }
  func.func @transform_12(%arg0: i32) -> (i32, i32) {
    %c0_i32 = arith.constant 0 : i32
    %c0_i32_0 = arith.constant 0 : i32
    %c0_i32_1 = arith.constant 0 : i32
    return %c0_i32, %c0_i32_0 : i32, i32
  }
  func.func @transform_13(%arg0: i32) -> (i32, i32, i32) {
    %c0_i32 = arith.constant 0 : i32
    %c0_i32_0 = arith.constant 0 : i32
    %c0_i32_1 = arith.constant 0 : i32
    return %arg0, %c0_i32, %c0_i32_0 : i32, i32, i32
  }
}

module attributes {stable_mosaic.version = 11 : i64} {
  func.func @_mixer_kernel(%arg0: i32, %arg1: memref<4x16x128xf32, #tpu.memory_space<vmem>>, %arg2: memref<1x128xf32, #tpu.memory_space<vmem>>, %arg3: memref<1x128xf32, #tpu.memory_space<vmem>>, %arg4: memref<16x16xbf16, #tpu.memory_space<vmem>>, %arg5: memref<16x1xf32, #tpu.memory_space<vmem>>, %arg6: memref<16x16xbf16, #tpu.memory_space<vmem>>, %arg7: memref<16x1xf32, #tpu.memory_space<vmem>>, %arg8: memref<1x128xf32, #tpu.memory_space<vmem>>, %arg9: memref<1x128xf32, #tpu.memory_space<vmem>>, %arg10: memref<128x128xbf16, #tpu.memory_space<vmem>>, %arg11: memref<1x128xf32, #tpu.memory_space<vmem>>, %arg12: memref<128x128xbf16, #tpu.memory_space<vmem>>, %arg13: memref<1x128xf32, #tpu.memory_space<vmem>>, %arg14: memref<4x16x128xf32, #tpu.memory_space<vmem>>) attributes {dimension_semantics = [#tpu.dimension_semantics<parallel>], iteration_bounds = array<i64: 1>, scalar_prefetch = 0 : i64, scratch_operands = 0 : i64, tpu.core_type = #tpu.core_type<tc>, window_params = [{transform_indices = @transform_0, window_bounds = array<i64: 4, 16, 128>}, {pipeline_mode = #tpu.pipeline_mode<synchronous>, transform_indices = @transform_1, window_bounds = array<i64: 1, 128>}, {pipeline_mode = #tpu.pipeline_mode<synchronous>, transform_indices = @transform_2, window_bounds = array<i64: 1, 128>}, {pipeline_mode = #tpu.pipeline_mode<synchronous>, transform_indices = @transform_3, window_bounds = array<i64: 16, 16>}, {pipeline_mode = #tpu.pipeline_mode<synchronous>, transform_indices = @transform_4, window_bounds = array<i64: 16, 1>}, {pipeline_mode = #tpu.pipeline_mode<synchronous>, transform_indices = @transform_5, window_bounds = array<i64: 16, 16>}, {pipeline_mode = #tpu.pipeline_mode<synchronous>, transform_indices = @transform_6, window_bounds = array<i64: 16, 1>}, {pipeline_mode = #tpu.pipeline_mode<synchronous>, transform_indices = @transform_7, window_bounds = array<i64: 1, 128>}, {pipeline_mode = #tpu.pipeline_mode<synchronous>, transform_indices = @transform_8, window_bounds = array<i64: 1, 128>}, {pipeline_mode = #tpu.pipeline_mode<synchronous>, transform_indices = @transform_9, window_bounds = array<i64: 128, 128>}, {pipeline_mode = #tpu.pipeline_mode<synchronous>, transform_indices = @transform_10, window_bounds = array<i64: 1, 128>}, {pipeline_mode = #tpu.pipeline_mode<synchronous>, transform_indices = @transform_11, window_bounds = array<i64: 128, 128>}, {pipeline_mode = #tpu.pipeline_mode<synchronous>, transform_indices = @transform_12, window_bounds = array<i64: 1, 128>}, {transform_indices = @transform_13, window_bounds = array<i64: 4, 16, 128>}]} {
    %c0 = arith.constant 0 : index
    %c0_0 = arith.constant 0 : index
    %c0_1 = arith.constant 0 : index
    %0 = vector.load %arg1[%c0, %c0_0, %c0_1] : memref<4x16x128xf32, #tpu.memory_space<vmem>>, vector<4x16x128xf32>
    %c0_2 = arith.constant 0 : index
    %c0_3 = arith.constant 0 : index
    %1 = vector.load %arg2[%c0_2, %c0_3] : memref<1x128xf32, #tpu.memory_space<vmem>>, vector<1x128xf32>
    %c0_4 = arith.constant 0 : index
    %c0_5 = arith.constant 0 : index
    %2 = vector.load %arg3[%c0_4, %c0_5] : memref<1x128xf32, #tpu.memory_space<vmem>>, vector<1x128xf32>
    %cst = arith.constant dense<0.000000e+00> : vector<4x16xf32>
    %3 = vector.multi_reduction <add>, %0, %cst [2] : vector<4x16x128xf32> to vector<4x16xf32>
    %4 = vector.shape_cast %3 : vector<4x16xf32> to vector<4x16x1xf32>
    %cst_6 = arith.constant 1.280000e+02 : f32
    %5 = vector.broadcast %cst_6 : f32 to vector<4x16x1xf32>
    %6 = arith.divf %4, %5 : vector<4x16x1xf32>
    %7 = vector.broadcast %6 : vector<4x16x1xf32> to vector<4x16x128xf32>
    %8 = arith.subf %0, %7 : vector<4x16x128xf32>
    %9 = arith.mulf %8, %8 : vector<4x16x128xf32>
    %cst_7 = arith.constant dense<0.000000e+00> : vector<4x16xf32>
    %10 = vector.multi_reduction <add>, %9, %cst_7 [2] : vector<4x16x128xf32> to vector<4x16xf32>
    %11 = vector.shape_cast %10 : vector<4x16xf32> to vector<4x16x1xf32>
    %cst_8 = arith.constant 1.280000e+02 : f32
    %12 = vector.broadcast %cst_8 : f32 to vector<4x16x1xf32>
    %13 = arith.divf %11, %12 : vector<4x16x1xf32>
    %cst_9 = arith.constant 9.99999974E-6 : f32
    %14 = vector.broadcast %cst_9 : f32 to vector<4x16x1xf32>
    %15 = arith.addf %13, %14 : vector<4x16x1xf32>
    %16 = math.rsqrt %15 : vector<4x16x1xf32>
    %17 = vector.broadcast %16 : vector<4x16x1xf32> to vector<4x16x128xf32>
    %18 = arith.mulf %8, %17 : vector<4x16x128xf32>
    %19 = vector.shape_cast %1 : vector<1x128xf32> to vector<1x1x128xf32>
    %20 = vector.broadcast %19 : vector<1x1x128xf32> to vector<4x16x128xf32>
    %21 = arith.mulf %18, %20 : vector<4x16x128xf32>
    %22 = vector.shape_cast %2 : vector<1x128xf32> to vector<1x1x128xf32>
    %23 = vector.broadcast %22 : vector<1x1x128xf32> to vector<4x16x128xf32>
    %24 = arith.addf %21, %23 : vector<4x16x128xf32>
    %25 = arith.truncf %24 : vector<4x16x128xf32> to vector<4x16x128xbf16>
    %c0_10 = arith.constant 0 : index
    %c0_11 = arith.constant 0 : index
    %26 = vector.load %arg4[%c0_10, %c0_11] : memref<16x16xbf16, #tpu.memory_space<vmem>>, vector<16x16xbf16>
    %27 = vector.shape_cast %26 : vector<16x16xbf16> to vector<1x16x16xbf16>
    %28 = vector.broadcast %27 : vector<1x16x16xbf16> to vector<4x16x16xbf16>
    %c0_12 = arith.constant 0 : index
    %c0_13 = arith.constant 0 : index
    %29 = vector.load %arg6[%c0_12, %c0_13] : memref<16x16xbf16, #tpu.memory_space<vmem>>, vector<16x16xbf16>
    %30 = vector.shape_cast %29 : vector<16x16xbf16> to vector<1x16x16xbf16>
    %31 = vector.broadcast %30 : vector<1x16x16xbf16> to vector<4x16x16xbf16>
    "tpu.trace_start"() <{level = 10 : i32, message = "bts,bsc->btc"}> : () -> ()
    %cst_14 = arith.constant dense<0.000000e+00> : vector<4x16x128xf32>
    %32 = tpu.matmul %28, %25, %cst_14 {dimension_numbers = #tpu.dot_dimension_numbers<[2], [1], [1], [2], [0, 0, 0, 1, 1, 2], [0], [0]>} : vector<4x16x16xbf16>, vector<4x16x128xbf16>, vector<4x16x128xf32> -> vector<4x16x128xf32>
    "tpu.trace_stop"() : () -> ()
    %c0_15 = arith.constant 0 : index
    %c0_16 = arith.constant 0 : index
    %33 = vector.load %arg5[%c0_15, %c0_16] : memref<16x1xf32, #tpu.memory_space<vmem>>, vector<16x1xf32>
    %34 = vector.shape_cast %33 : vector<16x1xf32> to vector<1x16x1xf32>
    %35 = vector.broadcast %34 : vector<1x16x1xf32> to vector<4x16x128xf32>
    %36 = arith.addf %32, %35 : vector<4x16x128xf32>
    %cst_17 = arith.constant 0.000000e+00 : f32
    %37 = vector.broadcast %cst_17 : f32 to vector<4x16x128xf32>
    %38 = arith.cmpf oge, %36, %37 : vector<4x16x128xf32>
    %cst_18 = arith.constant 2.000000e-01 : f32
    %39 = vector.broadcast %cst_18 : f32 to vector<4x16x128xf32>
    %40 = arith.mulf %39, %36 : vector<4x16x128xf32>
    %41 = arith.select %38, %36, %40 : vector<4x16x128xi1>, vector<4x16x128xf32>
    %42 = arith.truncf %41 : vector<4x16x128xf32> to vector<4x16x128xbf16>
    "tpu.trace_start"() <{level = 10 : i32, message = "bts,bsc->btc"}> : () -> ()
    %cst_19 = arith.constant dense<0.000000e+00> : vector<4x16x128xf32>
    %43 = tpu.matmul %31, %42, %cst_19 {dimension_numbers = #tpu.dot_dimension_numbers<[2], [1], [1], [2], [0, 0, 0, 1, 1, 2], [0], [0]>} : vector<4x16x16xbf16>, vector<4x16x128xbf16>, vector<4x16x128xf32> -> vector<4x16x128xf32>
    "tpu.trace_stop"() : () -> ()
    %c0_20 = arith.constant 0 : index
    %c0_21 = arith.constant 0 : index
    %44 = vector.load %arg7[%c0_20, %c0_21] : memref<16x1xf32, #tpu.memory_space<vmem>>, vector<16x1xf32>
    %45 = vector.shape_cast %44 : vector<16x1xf32> to vector<1x16x1xf32>
    %46 = vector.broadcast %45 : vector<1x16x1xf32> to vector<4x16x128xf32>
    %47 = arith.addf %43, %46 : vector<4x16x128xf32>
    %48 = arith.addf %47, %0 : vector<4x16x128xf32>
    %49 = vector.shape_cast %48 : vector<4x16x128xf32> to vector<64x128xf32>
    %c0_22 = arith.constant 0 : index
    %c0_23 = arith.constant 0 : index
    %50 = vector.load %arg8[%c0_22, %c0_23] : memref<1x128xf32, #tpu.memory_space<vmem>>, vector<1x128xf32>
    %c0_24 = arith.constant 0 : index
    %c0_25 = arith.constant 0 : index
    %51 = vector.load %arg9[%c0_24, %c0_25] : memref<1x128xf32, #tpu.memory_space<vmem>>, vector<1x128xf32>
    %cst_26 = arith.constant dense<0.000000e+00> : vector<64xf32>
    %52 = vector.multi_reduction <add>, %49, %cst_26 [1] : vector<64x128xf32> to vector<64xf32>
    %53 = vector.shape_cast %52 : vector<64xf32> to vector<64x1xf32>
    %cst_27 = arith.constant 1.280000e+02 : f32
    %54 = vector.broadcast %cst_27 : f32 to vector<64x1xf32>
    %55 = arith.divf %53, %54 : vector<64x1xf32>
    %56 = vector.broadcast %55 : vector<64x1xf32> to vector<64x128xf32>
    %57 = arith.subf %49, %56 : vector<64x128xf32>
    %58 = arith.mulf %57, %57 : vector<64x128xf32>
    %cst_28 = arith.constant dense<0.000000e+00> : vector<64xf32>
    %59 = vector.multi_reduction <add>, %58, %cst_28 [1] : vector<64x128xf32> to vector<64xf32>
    %60 = vector.shape_cast %59 : vector<64xf32> to vector<64x1xf32>
    %cst_29 = arith.constant 1.280000e+02 : f32
    %61 = vector.broadcast %cst_29 : f32 to vector<64x1xf32>
    %62 = arith.divf %60, %61 : vector<64x1xf32>
    %cst_30 = arith.constant 9.99999974E-6 : f32
    %63 = vector.broadcast %cst_30 : f32 to vector<64x1xf32>
    %64 = arith.addf %62, %63 : vector<64x1xf32>
    %65 = math.rsqrt %64 : vector<64x1xf32>
    %66 = vector.broadcast %65 : vector<64x1xf32> to vector<64x128xf32>
    %67 = arith.mulf %57, %66 : vector<64x128xf32>
    %68 = vector.broadcast %50 : vector<1x128xf32> to vector<64x128xf32>
    %69 = arith.mulf %67, %68 : vector<64x128xf32>
    %70 = vector.broadcast %51 : vector<1x128xf32> to vector<64x128xf32>
    %71 = arith.addf %69, %70 : vector<64x128xf32>
    %72 = arith.truncf %71 : vector<64x128xf32> to vector<64x128xbf16>
    %c0_31 = arith.constant 0 : index
    %c0_32 = arith.constant 0 : index
    %73 = vector.load %arg10[%c0_31, %c0_32] : memref<128x128xbf16, #tpu.memory_space<vmem>>, vector<128x128xbf16>
    %cst_33 = arith.constant dense<0.000000e+00> : vector<64x128xf32>
    %74 = tpu.matmul %72, %73, %cst_33 {dimension_numbers = #tpu.dot_dimension_numbers<[1], [0], [0], [1], [0, 0, 1, 1], [], []>} : vector<64x128xbf16>, vector<128x128xbf16>, vector<64x128xf32> -> vector<64x128xf32>
    %c0_34 = arith.constant 0 : index
    %c0_35 = arith.constant 0 : index
    %75 = vector.load %arg11[%c0_34, %c0_35] : memref<1x128xf32, #tpu.memory_space<vmem>>, vector<1x128xf32>
    %76 = vector.broadcast %75 : vector<1x128xf32> to vector<64x128xf32>
    %77 = arith.addf %74, %76 : vector<64x128xf32>
    %cst_36 = arith.constant 0.000000e+00 : f32
    %78 = vector.broadcast %cst_36 : f32 to vector<64x128xf32>
    %79 = arith.cmpf oge, %77, %78 : vector<64x128xf32>
    %cst_37 = arith.constant 2.000000e-01 : f32
    %80 = vector.broadcast %cst_37 : f32 to vector<64x128xf32>
    %81 = arith.mulf %80, %77 : vector<64x128xf32>
    %82 = arith.select %79, %77, %81 : vector<64x128xi1>, vector<64x128xf32>
    %83 = arith.truncf %82 : vector<64x128xf32> to vector<64x128xbf16>
    %c0_38 = arith.constant 0 : index
    %c0_39 = arith.constant 0 : index
    %84 = vector.load %arg12[%c0_38, %c0_39] : memref<128x128xbf16, #tpu.memory_space<vmem>>, vector<128x128xbf16>
    %cst_40 = arith.constant dense<0.000000e+00> : vector<64x128xf32>
    %85 = tpu.matmul %83, %84, %cst_40 {dimension_numbers = #tpu.dot_dimension_numbers<[1], [0], [0], [1], [0, 0, 1, 1], [], []>} : vector<64x128xbf16>, vector<128x128xbf16>, vector<64x128xf32> -> vector<64x128xf32>
    %c0_41 = arith.constant 0 : index
    %c0_42 = arith.constant 0 : index
    %86 = vector.load %arg13[%c0_41, %c0_42] : memref<1x128xf32, #tpu.memory_space<vmem>>, vector<1x128xf32>
    %87 = vector.broadcast %86 : vector<1x128xf32> to vector<64x128xf32>
    %88 = arith.addf %85, %87 : vector<64x128xf32>
    %89 = arith.addf %88, %49 : vector<64x128xf32>
    %90 = vector.shape_cast %89 : vector<64x128xf32> to vector<4x16x128xf32>
    %c0_43 = arith.constant 0 : index
    %c0_44 = arith.constant 0 : index
    %c0_45 = arith.constant 0 : index
    %91 = vector.load %arg14[%c0_43, %c0_44, %c0_45] : memref<4x16x128xf32, #tpu.memory_space<vmem>>, vector<4x16x128xf32>
    tpu.vector_store %arg14[%c0_43, %c0_44, %c0_45], %90 {strides = array<i32>} : memref<4x16x128xf32, #tpu.memory_space<vmem>>, vector<4x16x128xf32>,
    return
  }
  func.func @transform_0(%arg0: i32) -> (i32, i32, i32) {
    %c0_i32 = arith.constant 0 : i32
    %c0_i32_0 = arith.constant 0 : i32
    %c0_i32_1 = arith.constant 0 : i32
    return %arg0, %c0_i32, %c0_i32_0 : i32, i32, i32
  }
  func.func @transform_1(%arg0: i32) -> (i32, i32) {
    %c0_i32 = arith.constant 0 : i32
    %c0_i32_0 = arith.constant 0 : i32
    %c0_i32_1 = arith.constant 0 : i32
    return %c0_i32, %c0_i32_0 : i32, i32
  }
  func.func @transform_2(%arg0: i32) -> (i32, i32) {
    %c0_i32 = arith.constant 0 : i32
    %c0_i32_0 = arith.constant 0 : i32
    %c0_i32_1 = arith.constant 0 : i32
    return %c0_i32, %c0_i32_0 : i32, i32
  }
  func.func @transform_3(%arg0: i32) -> (i32, i32) {
    %c0_i32 = arith.constant 0 : i32
    %c0_i32_0 = arith.constant 0 : i32
    %c0_i32_1 = arith.constant 0 : i32
    return %c0_i32, %c0_i32_0 : i32, i32
  }
  func.func @transform_4(%arg0: i32) -> (i32, i32) {
    %c0_i32 = arith.constant 0 : i32
    %c0_i32_0 = arith.constant 0 : i32
    %c0_i32_1 = arith.constant 0 : i32
    return %c0_i32, %c0_i32_0 : i32, i32
  }
  func.func @transform_5(%arg0: i32) -> (i32, i32) {
    %c0_i32 = arith.constant 0 : i32
    %c0_i32_0 = arith.constant 0 : i32
    %c0_i32_1 = arith.constant 0 : i32
    return %c0_i32, %c0_i32_0 : i32, i32
  }
  func.func @transform_6(%arg0: i32) -> (i32, i32) {
    %c0_i32 = arith.constant 0 : i32
    %c0_i32_0 = arith.constant 0 : i32
    %c0_i32_1 = arith.constant 0 : i32
    return %c0_i32, %c0_i32_0 : i32, i32
  }
  func.func @transform_7(%arg0: i32) -> (i32, i32) {
    %c0_i32 = arith.constant 0 : i32
    %c0_i32_0 = arith.constant 0 : i32
    %c0_i32_1 = arith.constant 0 : i32
    return %c0_i32, %c0_i32_0 : i32, i32
  }
  func.func @transform_8(%arg0: i32) -> (i32, i32) {
    %c0_i32 = arith.constant 0 : i32
    %c0_i32_0 = arith.constant 0 : i32
    %c0_i32_1 = arith.constant 0 : i32
    return %c0_i32, %c0_i32_0 : i32, i32
  }
  func.func @transform_9(%arg0: i32) -> (i32, i32) {
    %c0_i32 = arith.constant 0 : i32
    %c0_i32_0 = arith.constant 0 : i32
    %c0_i32_1 = arith.constant 0 : i32
    return %c0_i32, %c0_i32_0 : i32, i32
  }
  func.func @transform_10(%arg0: i32) -> (i32, i32) {
    %c0_i32 = arith.constant 0 : i32
    %c0_i32_0 = arith.constant 0 : i32
    %c0_i32_1 = arith.constant 0 : i32
    return %c0_i32, %c0_i32_0 : i32, i32
  }
  func.func @transform_11(%arg0: i32) -> (i32, i32) {
    %c0_i32 = arith.constant 0 : i32
    %c0_i32_0 = arith.constant 0 : i32
    %c0_i32_1 = arith.constant 0 : i32
    return %c0_i32, %c0_i32_0 : i32, i32
  }
  func.func @transform_12(%arg0: i32) -> (i32, i32) {
    %c0_i32 = arith.constant 0 : i32
    %c0_i32_0 = arith.constant 0 : i32
    %c0_i32_1 = arith.constant 0 : i32
    return %c0_i32, %c0_i32_0 : i32, i32
  }
  func.func @transform_13(%arg0: i32) -> (i32, i32, i32) {
    %c0_i32 = arith.constant 0 : i32
    %c0_i32_0 = arith.constant 0 : i32
    %c0_i32_1 = arith.constant 0 : i32
    return %arg0, %c0_i32, %c0_i32_0 : i32, i32, i32
  }
}

</mosaic_0001>

<bundles_post_ra>
// kernel: tpu_custom_call.1
= control target key start
LH: loop header
LB: loop body
LE: loop exit
PB: predicated region body
PF: predicated region fallthrough
CT: control target
= control target key end

     0   :  { %18 = vsyncpa [#allocation3], 0  ;;  %s1691_s0 = inlined_call_operand.hbm [shape: f32[4,16,128], index: 0, kind: input, shape index: {}, may-alias: {0,13}]   ;;  %s1692_s1 = inlined_call_operand.vmem [shape: f32[1,128], index: 1, kind: input, shape index: {}]   ;;  %s1693_s2 = inlined_call_operand.vmem [shape: f32[1,128], index: 2, kind: input, shape index: {}]   ;;  %s1694_s3 = inlined_call_operand.vmem [shape: bf16[16,16], index: 3, kind: input, shape index: {}]   ;;  %s1695_s4 = inlined_call_operand.vmem [shape: f32[16,1], index: 4, kind: input, shape index: {}]   ;;  %s1696_s5 = inlined_call_operand.vmem [shape: bf16[16,16], index: 5, kind: input, shape index: {}]   ;;  %s1697_s6 = inlined_call_operand.vmem [shape: f32[16,1], index: 6, kind: input, shape index: {}]   ;;  %s1698_s7 = inlined_call_operand.vmem [shape: f32[1,128], index: 7, kind: input, shape index: {}]   ;;  %s1699_s8 = inlined_call_operand.vmem [shape: f32[1,128], index: 8, kind: input, shape index: {}]   ;;  %s1700_s9 = inlined_call_operand.vmem [shape: bf16[128,128], index: 9, kind: input, shape index: {}]   ;;  %s1701_s10 = inlined_call_operand.vmem [shape: f32[1,128], index: 10, kind: input, shape index: {}]   ;;  %s1702_s11 = inlined_call_operand.vmem [shape: bf16[128,128], index: 11, kind: input, shape index: {}]   ;;  %s1703_s12 = inlined_call_operand.vmem [shape: f32[1,128], index: 12, kind: input, shape index: {}]   ;;  %s1704_s13 = inlined_call_operand.hbm [shape: f32[4,16,128], index: 13, kind: output, shape index: {}, may-alias: {0,13}]  }
   0x1   :  { %19 = vsyncpa [#allocation4], 0  ;;  %s1326_s25 = smov [#allocation2]  }
   0x2   :  { %s25_s26 = sshll.u32 %s1326_s25, 4  ;;  %s26_s26 = int_to_ptr.vmem [resolvable:$true] %s25_s26 }
   0x3   :  { %s1290_s27 = scalar_lea.vmem %s26_s26, 1024  ;;  %p1295_p1 = scmp.lt.s32.totalorder %s26_s26, %s26_s26 }
   0x4   :  { %p1291_p0 = scmp.ne.s32.totalorder %s26_s26, %s1290_s27  ;;  %p1296_p2 = scmp.lt.s32.totalorder %s1290_s27, %s1290_s27 }
   0x6   :  { %p1297_p3 = por %p1296_p2, %p1295_p1 }
   0x8   :  { %p1298_p4 = pnand %p1297_p3, %p1291_p0 }
   0xa   :  { %1301 = shalt.err (!%p1298_p4)
}
   0xb   :  { %s1327_s28 = smov 128   ;;  %s1328_s29 = smov 8  }
   0xc   :  { %31 = dma.hbm_to_vmem [thread:$0]  %s1691_s0, 1024, %s26_s26, [#allocation3], %s1327_s28, %s1327_s28, %s1328_s29  }
   0xd   :  { %1322 = dma.done.wait [#allocation3], 1024  }
   0xe   :  { %1323 = vsyncadd [#allocation3], 4294966272  ;;  %v1409_v0 = vld [vmem:[#allocation2] sm:$0xff]  ;;  %v1411_v1 = vld [vmem:[#allocation2 + $0x10] sm:$0xff]  ;;  %v1329_v40 = vmov 0.0   ;;  %vm1330_vm0 = vmmov 0  }
   0xf   :  { %70 = vadd.xlane.f32.xlu0 %v1409_v0  ;;  %74 = vadd.xlane.f32.xlu1 %v1411_v1  ;;  %v1415_v2 = vld [vmem:[#allocation2 + $0x8] sm:$0xff]  ;;  %v1417_v3 = vld [vmem:[#allocation2 + $0x18] sm:$0xff]  ;;  %v1419_v4 = vld [vmem:[#allocation2 + $0x20] sm:$0xff]  ;;  %v1331_v43 = vmov 0   ;;  %vm212_vm1 = vcmask 130048  }
  0x10   :  { %v1421_v5 = vld [vmem:[#allocation2 + $0x28] sm:$0xff]  ;;  %v1425_v6 = vld [vmem:[#allocation2 + $0x30] sm:$0xff]  ;;  %v1427_v7 = vld [vmem:[#allocation2 + $0x38] sm:$0xff]  ;;  %1127 = vmatprep.subr.bf16.mxu0 %v1329_v40  ;;  %1133 = vmatprep.subr.bf16.mxu1 %v1329_v40 }
  0x11   :  { %1129 = vmatprep.mubr.msk.bf16.mxu0 %vm1330_vm0, %v1329_v40  ;;  %1135 = vmatprep.mubr.msk.bf16.mxu1 %vm1330_vm0, %v1329_v40  ;;  %v196_v41 = vld [vmem:[%s1695_s4 + $0x8] sm:$0xff]  ;;  %v195_v42 = vld [vmem:[%s1695_s4] sm:$0xff] }
  0x12   :  { %1231 = vset.pattern.permute.xlu1 %v1331_v43  ;;  %1230 = vset.pattern.permute.xlu0 %v1331_v43  ;;  %v408_v44 = vld [vmem:[%s1697_s6] sm:$0xff]  ;;  %v409_v45 = vld [vmem:[%s1697_s6 + $0x8] sm:$0xff] }
  0x13   :  { %72 = vadd.xlane.f32.xlu0 %v1415_v2  ;;  %76 = vadd.xlane.f32.xlu1 %v1417_v3 }
  0x17   :  { %78 = vadd.xlane.f32.xlu0 %v1419_v4  ;;  %80 = vadd.xlane.f32.xlu1 %v1421_v5 }
  0x1b   :  { %82 = vadd.xlane.f32.xlu0 %v1425_v6  ;;  %84 = vadd.xlane.f32.xlu1 %v1427_v7 }
  0x98   :  { %v71_v8 = vpop.xlane.xlu0 %70  ;;  %v75_v9 = vpop.xlane.xlu1 %74 }
  0x99   :  { %v87_v10 = vmul.f32 0.0078125, %v71_v8  ;;  %v89_v11 = vmul.f32 0.0078125, %v75_v9 }
  0x9b   :  { %v1434_v12 = vsub.f32 %v1409_v0, %v87_v10  ;;  %v1437_v13 = vsub.f32 %v1411_v1, %v89_v11 }
  0x9c   :  { %v73_v14 = vpop.xlane.xlu0 %72  ;;  %v77_v15 = vpop.xlane.xlu1 %76 }
  0x9d   :  { %v88_v16 = vmul.f32 0.0078125, %v73_v14  ;;  %v103_v17 = vmul.f32 %v1434_v12, %v1434_v12  ;;  %v90_v18 = vmul.f32 0.0078125, %v77_v15  ;;  %v105_v21 = vmul.f32 %v1437_v13, %v1437_v13 }
  0x9f   :  { %v1442_v19 = vsub.f32 %v1415_v2, %v88_v16  ;;  %111 = vadd.xlane.f32.xlu0 %v103_v17  ;;  %v1445_v20 = vsub.f32 %v1417_v3, %v90_v18  ;;  %v1055_v18 = vld [vmem:[%s1692_s1] ss:$0 sm:$0xff] }
  0xa0   :  { %v79_v22 = vpop.xlane.xlu0 %78  ;;  %v81_v23 = vpop.xlane.xlu1 %80 }
  0xa1   :  { %v91_v24 = vmul.f32 0.0078125, %v79_v22  ;;  %v104_v25 = vmul.f32 %v1442_v19, %v1442_v19  ;;  %v92_v26 = vmul.f32 0.0078125, %v81_v23  ;;  %v106_v29 = vmul.f32 %v1445_v20, %v1445_v20 }
  0xa3   :  { %v1452_v27 = vsub.f32 %v1419_v4, %v91_v24  ;;  %115 = vadd.xlane.f32.xlu0 %v105_v21  ;;  %113 = vadd.xlane.f32.xlu1 %v104_v25  ;;  %v1455_v28 = vsub.f32 %v1421_v5, %v92_v26  ;;  %v1056_v25 = vld [vmem:[%s1693_s2] ss:$0 sm:$0xff] }
  0xa4   :  { %v83_v30 = vpop.xlane.xlu0 %82  ;;  %v85_v31 = vpop.xlane.xlu1 %84 }
  0xa5   :  { %v93_v32 = vmul.f32 0.0078125, %v83_v30  ;;  %v107_v33 = vmul.f32 %v1452_v27, %v1452_v27  ;;  %v94_v34 = vmul.f32 0.0078125, %v85_v31  ;;  %v108_v37 = vmul.f32 %v1455_v28, %v1455_v28 }
  0xa7   :  { %v1462_v35 = vsub.f32 %v1425_v6, %v93_v32  ;;  %117 = vadd.xlane.f32.xlu1 %v106_v29  ;;  %119 = vadd.xlane.f32.xlu0 %v107_v33  ;;  %v1465_v36 = vsub.f32 %v1427_v7, %v94_v34 }
  0xa9   :  { %v109_v38 = vmul.f32 %v1462_v35, %v1462_v35  ;;  %v110_v39 = vmul.f32 %v1465_v36, %v1465_v36 }
  0xab   :  { %121 = vadd.xlane.f32.xlu1 %v108_v37  ;;  %123 = vadd.xlane.f32.xlu0 %v109_v38 }
  0xaf   :  { %125 = vadd.xlane.f32.xlu1 %v110_v39 }
  0xc0   :  { %204 = vperm.xlu1 %1231, %v196_v41   ;;  %v1232_v41 = vld [vmem:[%s1694_s3] sm:$0xff]  }
  0xc1   :  { %199 = vperm.xlu0 %1230, %v195_v42  }
  0xc4   :  { %412 = vperm.xlu1 %1231, %v408_v44  }
  0xc8   :  { %417 = vperm.xlu1 %1231, %v409_v45  }
 0x128   :  { %v112_v46 = vpop.xlane.xlu0 %111 }
 0x129   :  { %v127_v47 = vmul.f32 0.0078125, %v112_v46 }
 0x12b   :  { %v135_v48 = vadd.f32 1e-05, %v127_v47 }
 0x12c   :  { %v114_v49 = vpop.xlane.xlu1 %113  ;;  %v116_v50 = vpop.xlane.xlu0 %115 }
 0x12d   :  { %1250 = vrsqrt.f32 %v135_v48  ;;  %v128_v51 = vmul.f32 0.0078125, %v114_v49  ;;  %v129_v52 = vmul.f32 0.0078125, %v116_v50 }
 0x12f   :  { %v136_v53 = vadd.f32 1e-05, %v128_v51  ;;  %v137_v54 = vadd.f32 1e-05, %v129_v52 }
 0x130   :  { %v118_v55 = vpop.xlane.xlu1 %117  ;;  %v120_v56 = vpop.xlane.xlu0 %119 }
 0x131   :  { %1252 = vrsqrt.f32 %v136_v53  ;;  %v130_v57 = vmul.f32 0.0078125, %v118_v55  ;;  %v131_v58 = vmul.f32 0.0078125, %v120_v56 }
 0x132   :  { %1254 = vrsqrt.f32 %v137_v54 }
 0x133   :  { %v138_v59 = vadd.f32 1e-05, %v130_v57  ;;  %v139_v60 = vadd.f32 1e-05, %v131_v58 }
 0x134   :  { %v122_v61 = vpop.xlane.xlu1 %121  ;;  %v124_v62 = vpop.xlane.xlu0 %123 }
 0x135   :  { %1256 = vrsqrt.f32 %v138_v59  ;;  %v132_v63 = vmul.f32 0.0078125, %v122_v61  ;;  %v133_v8 = vmul.f32 0.0078125, %v124_v62 }
 0x136   :  { %1258 = vrsqrt.f32 %v139_v60 }
 0x137   :  { %v140_v9 = vadd.f32 1e-05, %v132_v63  ;;  %v141_v10 = vadd.f32 1e-05, %v133_v8 }
 0x138   :  { %v126_v11 = vpop.xlane.xlu1 %125 }
 0x139   :  { %1260 = vrsqrt.f32 %v140_v9  ;;  %v134_v14 = vmul.f32 0.0078125, %v126_v11 }
 0x13a   :  { %v1251_v15 = vpop.eup %1250  ;;  %1262 = vrsqrt.f32 %v141_v10 }
 0x13b   :  { %v142_v16 = vadd.f32 1e-05, %v134_v14  ;;  %v151_v17 = vmul.f32 %v1251_v15, %v1434_v12 }
 0x13c   :  { %v205_v58 = vpop.permute.xlu1 %204 }
 0x13d   :  { %1264 = vrsqrt.f32 %v142_v16  ;;  %v165_v24 = vmul.f32 %v1055_v18, %v151_v17 }
 0x13e   :  { %v1253_v21 = vpop.eup %1252 }
 0x13f   :  { %v1255_v22 = vpop.eup %1254  ;;  %v152_v23 = vmul.f32 %v1253_v21, %v1442_v19  ;;  %v179_v12 = vadd.f32 %v1056_v25, %v165_v24 }
 0x140   :  { %v153_v26 = vmul.f32 %v1255_v22, %v1437_v13 }
 0x141   :  { %v166_v29 = vmul.f32 %v1055_v18, %v152_v23 }
 0x142   :  { %v1257_v30 = vpop.eup %1256  ;;  %v167_v34 = vmul.f32 %v1055_v18, %v153_v26  ;;  %v1233_v26 = vld [vmem:[%s1696_s5] sm:$0xff]  }
 0x143   :  { %v1259_v31 = vpop.eup %1258  ;;  %v180_v32 = vadd.f32 %v1056_v25, %v166_v29  ;;  %v154_v33 = vmul.f32 %v1257_v30, %v1445_v20 }
 0x144   :  { %v155_v37 = vmul.f32 %v1259_v31, %v1452_v27  ;;  %v181_v13 = vadd.f32 %v1056_v25, %v167_v34 }
 0x145   :  { %v187_v38 = vpack.c.bf16 %v180_v32, %v179_v12  ;;  %v168_v39 = vmul.f32 %v1055_v18, %v154_v33 }
 0x146   :  { %v1261_v19 = vpop.eup %1260  ;;  %v169_v42 = vmul.f32 %v1055_v18, %v155_v37 }
 0x147   :  { %v1263_v43 = vpop.eup %1262  ;;  %1128 = vmatpush3.bf16.msra.mxu0 %v187_v38  ;;  %v182_v44 = vadd.f32 %v1056_v25, %v168_v39  ;;  %v156_v45 = vmul.f32 %v1261_v19, %v1455_v28 }
 0x148   :  { %1139 = vmatprep.subr.bf16.mxu0 %v1329_v40  ;;  %v157_v20 = vmul.f32 %v1263_v43, %v1462_v35  ;;  %v183_v48 = vadd.f32 %v1056_v25, %v169_v42 }
 0x149   :  { %v188_v27 = vpack.c.bf16 %v182_v44, %v181_v13  ;;  %v170_v46 = vmul.f32 %v1055_v18, %v156_v45 }
 0x14a   :  { %v1265_v47 = vpop.eup %1264  ;;  %1130 = vmatmul.mubr.msk.bf16.vlgmr.msra.gmra.mxu0 %vm212_vm1, %v1232_v41  ;;  %v171_v51 = vmul.f32 %v1055_v18, %v157_v20 }
 0x14b   :  { %1134 = vmatpush3.bf16.msra.mxu1 %v188_v27  ;;  %v184_v49 = vadd.f32 %v1056_v25, %v170_v46  ;;  %1141 = vmatprep.mubr.msk.bf16.mxu0 %vm1330_vm0, %v1329_v40  ;;  %v158_v50 = vmul.f32 %v1265_v47, %v1465_v36  ;;  %v200_v36 = vpop.permute.xlu0 %199 }
 0x14c   :  { %1145 = vmatprep.subr.bf16.mxu1 %v1329_v40  ;;  %v185_v35 = vadd.f32 %v1056_v25, %v171_v51 }
 0x14d   :  { %v189_v28 = vpack.c.bf16 %v184_v49, %v183_v48  ;;  %v172_v52 = vmul.f32 %v1055_v18, %v158_v50  ;;  %v413_v49 = vpop.permute.xlu1 %412 }
 0x14e   :  { %1136 = vmatmul.mubr.msk.bf16.vlgmr.msra.gmra.mxu1 %vm212_vm1, %v1232_v41 }
 0x14f   :  { %1140 = vmatpush3.bf16.msra.mxu0 %v189_v28  ;;  %v186_v53 = vadd.f32 %v1056_v25, %v172_v52  ;;  %1147 = vmatprep.mubr.msk.bf16.mxu1 %vm1330_vm0, %v1329_v40 }
 0x150   :  { %1151 = vmatprep.subr.bf16.mxu0 %v1329_v40 }
 0x151   :  { %v190_v54 = vpack.c.bf16 %v186_v53, %v185_v35  ;;  %v418_v52 = vpop.permute.xlu1 %417 }
 0x152   :  { %1142 = vmatmul.mubr.msk.bf16.vlgmr.msra.gmra.mxu0 %vm212_vm1, %v1232_v41 }
 0x153   :  { %1146 = vmatpush3.bf16.msra.mxu1 %v190_v54  ;;  %1153 = vmatprep.mubr.msk.bf16.mxu0 %vm1330_vm0, %v1329_v40 }
 0x154   :  { %1157 = vmatprep.subr.bf16.mxu1 %v1329_v40 }
 0x156   :  { %1148 = vmatmul.mubr.msk.bf16.vlgmr.msra.gmra.mxu1 %vm212_vm1, %v1232_v41 }
 0x157   :  { %1159 = vmatprep.mubr.msk.bf16.mxu1 %vm1330_vm0, %v1329_v40 }
 0x20a   :  { %v250_v55 = vpop.f32.mrf.mxu0 }
 0x20b   :  { %v251_v56 = vadd.f32 %v250_v55, %v200_v36 }
 0x20c   :  { %v1131_v57 = vpop.f32.mrf.mxu0 }
 0x20d   :  { %v388_v59 = vmul.f32 0.2, %v251_v56  ;;  %vm380_vm2 = vcmp.ge.f32.partialorder %v251_v56, 0.0 }
 0x20e   :  { %v253_v60 = vpop.f32.mrf.mxu0  ;;  %v291_v61 = vpop.f32.mrf.mxu1 }
 0x20f   :  { %v254_v62 = vadd.f32 %v253_v60, %v205_v58  ;;  %v292_v63 = vadd.f32 %v291_v61, %v200_v36  ;;  %v396_v11 = vsel %vm380_vm2, %v251_v56, %v388_v59 }
 0x210   :  { %v1132_v8 = vpop.f32.mrf.mxu0  ;;  %v1137_v9 = vpop.f32.mrf.mxu1 }
 0x211   :  { %vm381_vm3 = vcmp.ge.f32.partialorder %v254_v62, 0.0  ;;  %v389_v10 = vmul.f32 0.2, %v254_v62  ;;  %v390_v14 = vmul.f32 0.2, %v292_v63  ;;  %vm382_vm4 = vcmp.ge.f32.partialorder %v292_v63, 0.0 }
 0x212   :  { %v294_v15 = vpop.f32.mrf.mxu1  ;;  %v332_v16 = vpop.f32.mrf.mxu0 }
 0x213   :  { %v397_v17 = vsel %vm381_vm3, %v254_v62, %v389_v10  ;;  %v295_v18 = vadd.f32 %v294_v15, %v205_v58  ;;  %v333_v21 = vadd.f32 %v332_v16, %v200_v36  ;;  %v398_v29 = vsel %vm382_vm4, %v292_v63, %v390_v14 }
 0x214   :  { %v404_v22 = vpack.c.bf16 %v397_v17, %v396_v11  ;;  %v1138_v23 = vpop.f32.mrf.mxu1  ;;  %v1143_v24 = vpop.f32.mrf.mxu0 }
 0x215   :  { %vm383_vm5 = vcmp.ge.f32.partialorder %v295_v18, 0.0  ;;  %v391_v25 = vmul.f32 0.2, %v295_v18  ;;  %v392_v32 = vmul.f32 0.2, %v333_v21  ;;  %vm384_vm6 = vcmp.ge.f32.partialorder %v333_v21, 0.0 }
 0x216   :  { %v335_v30 = vpop.f32.mrf.mxu0  ;;  %v373_v31 = vpop.f32.mrf.mxu1  ;;  %1152 = vmatpush3.bf16.msra.mxu0 %v404_v22 }
 0x217   :  { %v399_v12 = vsel %vm383_vm5, %v295_v18, %v391_v25  ;;  %v336_v33 = vadd.f32 %v335_v30, %v205_v58  ;;  %v374_v34 = vadd.f32 %v373_v31, %v200_v36  ;;  %1163 = vmatprep.subr.bf16.mxu0 %v1329_v40  ;;  %v400_v42 = vsel %vm384_vm6, %v333_v21, %v392_v32 }
 0x218   :  { %v405_v37 = vpack.c.bf16 %v399_v12, %v398_v29  ;;  %v1144_v38 = vpop.f32.mrf.mxu0  ;;  %v1149_v39 = vpop.f32.mrf.mxu1 }
 0x219   :  { %vm385_vm7 = vcmp.ge.f32.partialorder %v336_v33, 0.0  ;;  %v393_v19 = vmul.f32 0.2, %v336_v33  ;;  %1154 = vmatmul.mubr.msk.bf16.vlgmr.msra.gmra.mxu0 %vm212_vm1, %v1233_v26  ;;  %v394_v13 = vmul.f32 0.2, %v374_v34  ;;  %vm386_vm8 = vcmp.ge.f32.partialorder %v374_v34, 0.0 }
 0x21a   :  { %v376_v41 = vpop.f32.mrf.mxu1  ;;  %1158 = vmatpush3.bf16.msra.mxu1 %v405_v37  ;;  %1165 = vmatprep.mubr.msk.bf16.mxu0 %vm1330_vm0, %v1329_v40 }
 0x21b   :  { %v401_v43 = vsel %vm385_vm7, %v336_v33, %v393_v19  ;;  %v377_v44 = vadd.f32 %v376_v41, %v205_v58  ;;  %1169 = vmatprep.subr.bf16.mxu1 %v1329_v40  ;;  %v402_v46 = vsel %vm386_vm8, %v374_v34, %v394_v13 }
 0x21c   :  { %v406_v45 = vpack.c.bf16 %v401_v43, %v400_v42  ;;  %v1150_v20 = vpop.f32.mrf.mxu1 }
 0x21d   :  { %vm387_vm9 = vcmp.ge.f32.partialorder %v377_v44, 0.0  ;;  %v395_v27 = vmul.f32 0.2, %v377_v44  ;;  %1160 = vmatmul.mubr.msk.bf16.vlgmr.msra.gmra.mxu1 %vm212_vm1, %v1233_v26  ;;  %v1234_v20 = vld [vmem:[%s1700_s9 + $0x38] sm:$0xff]  }
 0x21e   :  { %1164 = vmatpush3.bf16.msra.mxu0 %v406_v45  ;;  %1171 = vmatprep.mubr.msk.bf16.mxu1 %vm1330_vm0, %v1329_v40 }
 0x21f   :  { %v403_v47 = vsel %vm387_vm9, %v377_v44, %v395_v27  ;;  %1175 = vmatprep.subr.bf16.mxu0 %v1234_v20 }
 0x220   :  { %v407_v48 = vpack.c.bf16 %v403_v47, %v402_v46 }
 0x221   :  { %1166 = vmatmul.mubr.msk.bf16.vlgmr.msra.gmra.mxu0 %vm212_vm1, %v1233_v26 }
 0x222   :  { %1170 = vmatpush3.bf16.msra.mxu1 %v407_v48  ;;  %1176 = vmatpush3.bf16.msra.mxu0 %v1234_v20 }
 0x225   :  { %1172 = vmatmul.mubr.msk.bf16.vlgmr.msra.gmra.mxu1 %vm212_vm1, %v1233_v26 }
 0x2d9   :  { %v462_v50 = vpop.f32.mrf.mxu0 }
 0x2da   :  { %v463_v51 = vadd.f32 %v462_v50, %v413_v49  ;;  %v1235_v50 = vld [vmem:[%s1700_s9 + $0x30] sm:$0xff]  }
 0x2db   :  { %v1155_v28 = vpop.f32.mrf.mxu0  ;;  %1177 = vmatprep.subr.bf16.mxu0 %v1235_v50 }
 0x2dc   :  { %v1538_v35 = vadd.f32 %v463_v51, %v1409_v0  ;;  %1178 = vmatpush3.bf16.msra.mxu0 %v1235_v50 }
 0x2dd   :  { %v465_v53 = vpop.f32.mrf.mxu0  ;;  %v503_v54 = vpop.f32.mrf.mxu1 }
 0x2de   :  { %v466_v36 = vadd.f32 %v465_v53, %v418_v52  ;;  %v504_v40 = vadd.f32 %v503_v54, %v413_v49  ;;  %602 = vadd.xlane.f32.xlu1 %v1538_v35  ;;  %v1237_v53 = vld [vmem:[%s1700_s9 + $0x20] sm:$0xff]   ;;  %v1238_v54 = vld [vmem:[%s1700_s9 + $0x18] sm:$0xff]  }
 0x2df   :  { %v1156_v55 = vpop.f32.mrf.mxu0  ;;  %v1161_v56 = vpop.f32.mrf.mxu1 }
 0x2e0   :  { %v1542_v57 = vadd.f32 %v466_v36, %v1415_v2  ;;  %v1545_v58 = vadd.f32 %v504_v40, %v1411_v1  ;;  %v1239_v36 = vld [vmem:[%s1700_s9 + $0x10] sm:$0xff]   ;;  %v1240_v40 = vld [vmem:[%s1700_s9 + $0x8] sm:$0xff]   ;;  %v1241_v55 = vld [vmem:[%s1700_s9] sm:$0xff]  }
 0x2e1   :  { %v506_v59 = vpop.f32.mrf.mxu1  ;;  %v544_v60 = vpop.f32.mrf.mxu0  ;;  %v1242_v56 = vld [vmem:[%s1702_s11 + $0x38] sm:$0xff]  }
 0x2e2   :  { %v507_v61 = vadd.f32 %v506_v59, %v418_v52  ;;  %606 = vadd.xlane.f32.xlu1 %v1545_v58  ;;  %604 = vadd.xlane.f32.xlu0 %v1542_v57  ;;  %v545_v8 = vadd.f32 %v544_v60, %v413_v49  ;;  %v1243_v59 = vld [vmem:[%s1702_s11 + $0x30] sm:$0xff]   ;;  %v1244_v60 = vld [vmem:[%s1702_s11 + $0x28] sm:$0xff]  }
 0x2e3   :  { %v1162_v0 = vpop.f32.mrf.mxu1  ;;  %v1167_v62 = vpop.f32.mrf.mxu0  ;;  %1199 = vmatprep.subr.bf16.mxu1 %v1242_v56 }
 0x2e4   :  { %v1550_v63 = vadd.f32 %v507_v61, %v1417_v3  ;;  %v1554_v14 = vadd.f32 %v545_v8, %v1419_v4  ;;  %1200 = vmatpush3.bf16.msra.mxu1 %v1242_v56  ;;  %v1245_v61 = vld [vmem:[%s1702_s11 + $0x20] sm:$0xff]   ;;  %v1246_v0 = vld [vmem:[%s1702_s11 + $0x18] sm:$0xff]  }
 0x2e5   :  { %v547_v9 = vpop.f32.mrf.mxu0  ;;  %v585_v10 = vpop.f32.mrf.mxu1  ;;  %1201 = vmatprep.subr.bf16.mxu1 %v1243_v59 }
 0x2e6   :  { %v586_v2 = vadd.f32 %v585_v10, %v413_v49  ;;  %608 = vadd.xlane.f32.xlu1 %v1550_v63  ;;  %v548_v15 = vadd.f32 %v547_v9, %v418_v52 }
 0x2e7   :  { %v1173_v1 = vpop.f32.mrf.mxu1  ;;  %v1168_v11 = vpop.f32.mrf.mxu0 }
 0x2e8   :  { %v1557_v16 = vadd.f32 %v586_v2, %v1425_v6  ;;  %v1562_v18 = vadd.f32 %v548_v15, %v1421_v5  ;;  %1202 = vmatpush3.bf16.msra.mxu1 %v1243_v59 }
 0x2e9   :  { %v588_v17 = vpop.f32.mrf.mxu1  ;;  %1203 = vmatprep.subr.bf16.mxu1 %v1244_v60 }
 0x2ea   :  { %614 = vadd.xlane.f32.xlu0 %v1557_v16  ;;  %610 = vadd.xlane.f32.xlu1 %v1554_v14  ;;  %v589_v21 = vadd.f32 %v588_v17, %v418_v52  ;;  %v1236_v52 = vld [vmem:[%s1700_s9 + $0x28] sm:$0xff]  }
 0x2eb   :  { %v1174_v3 = vpop.f32.mrf.mxu1  ;;  %1179 = vmatprep.subr.bf16.mxu0 %v1236_v52 }
 0x2ec   :  { %v1566_v22 = vadd.f32 %v589_v21, %v1427_v7  ;;  %1180 = vmatpush3.bf16.msra.mxu0 %v1236_v52  ;;  %1204 = vmatpush3.bf16.msra.mxu1 %v1244_v60 }
 0x2ed   :  { %1181 = vmatprep.subr.bf16.mxu0 %v1237_v53  ;;  %1205 = vmatprep.subr.bf16.mxu1 %v1245_v61 }
 0x2ee   :  { %612 = vadd.xlane.f32.xlu1 %v1562_v18 }
 0x2f0   :  { %1182 = vmatpush3.bf16.msra.mxu0 %v1237_v53  ;;  %1206 = vmatpush3.bf16.msra.mxu1 %v1245_v61 }
 0x2f1   :  { %1183 = vmatprep.subr.bf16.mxu0 %v1238_v54  ;;  %1207 = vmatprep.subr.bf16.mxu1 %v1246_v0 }
 0x2f2   :  { %616 = vadd.xlane.f32.xlu1 %v1566_v22 }
 0x2f4   :  { %1184 = vmatpush3.bf16.msra.mxu0 %v1238_v54  ;;  %1208 = vmatpush3.bf16.msra.mxu1 %v1246_v0 }
 0x2f5   :  { %1185 = vmatprep.subr.bf16.mxu0 %v1239_v36 }
 0x2f8   :  { %1186 = vmatpush3.bf16.msra.mxu0 %v1239_v36 }
 0x2f9   :  { %1187 = vmatprep.subr.bf16.mxu0 %v1240_v40 }
 0x2fc   :  { %1188 = vmatpush3.bf16.msra.mxu0 %v1240_v40 }
 0x2fd   :  { %1189 = vmatprep.subr.bf16.mxu0 %v1241_v55 }
 0x300   :  { %1190 = vmatpush3.bf16.msra.mxu0 %v1241_v55 }
 0x367   :  { %v603_v4 = vpop.xlane.xlu1 %602 }
 0x368   :  { %v618_v6 = vmul.f32 0.0078125, %v603_v4 }
 0x36a   :  { %v1570_v23 = vsub.f32 %v1538_v35, %v618_v6 }
 0x36b   :  { %v607_v24 = vpop.xlane.xlu1 %606  ;;  %v605_v25 = vpop.xlane.xlu0 %604 }
 0x36c   :  { %v620_v26 = vmul.f32 0.0078125, %v607_v24  ;;  %v619_v29 = vmul.f32 0.0078125, %v605_v25  ;;  %v634_v5 = vmul.f32 %v1570_v23, %v1570_v23 }
 0x36e   :  { %v1575_v30 = vsub.f32 %v1545_v58, %v620_v26  ;;  %v1578_v7 = vsub.f32 %v1542_v57, %v619_v29  ;;  %642 = vadd.xlane.f32.xlu0 %v634_v5 }
 0x36f   :  { %v609_v31 = vpop.xlane.xlu1 %608 }
 0x370   :  { %v621_v12 = vmul.f32 0.0078125, %v609_v31  ;;  %v636_v32 = vmul.f32 %v1575_v30, %v1575_v30  ;;  %v635_v33 = vmul.f32 %v1578_v7, %v1578_v7 }
 0x372   :  { %v1585_v34 = vsub.f32 %v1550_v63, %v621_v12  ;;  %646 = vadd.xlane.f32.xlu0 %v636_v32  ;;  %644 = vadd.xlane.f32.xlu1 %v635_v33 }
 0x373   :  { %v615_v37 = vpop.xlane.xlu0 %614  ;;  %v611_v38 = vpop.xlane.xlu1 %610 }
 0x374   :  { %v624_v39 = vmul.f32 0.0078125, %v615_v37  ;;  %v622_v19 = vmul.f32 0.0078125, %v611_v38  ;;  %v637_v41 = vmul.f32 %v1585_v34, %v1585_v34 }
 0x376   :  { %v1590_v42 = vsub.f32 %v1554_v14, %v622_v19  ;;  %648 = vadd.xlane.f32.xlu1 %v637_v41  ;;  %v1593_v13 = vsub.f32 %v1557_v16, %v624_v39  ;;  %v1067_v19 = vld [vmem:[%s1698_s7] ss:$0 sm:$0xff] }
 0x377   :  { %v613_v43 = vpop.xlane.xlu1 %612 }
 0x378   :  { %v623_v44 = vmul.f32 0.0078125, %v613_v43  ;;  %v638_v45 = vmul.f32 %v1590_v42, %v1590_v42  ;;  %v640_v48 = vmul.f32 %v1593_v13, %v1593_v13 }
 0x37a   :  { %v1601_v27 = vsub.f32 %v1562_v18, %v623_v44  ;;  %650 = vadd.xlane.f32.xlu0 %v638_v45 }
 0x37b   :  { %v617_v46 = vpop.xlane.xlu1 %616 }
 0x37c   :  { %v625_v47 = vmul.f32 0.0078125, %v617_v46  ;;  %v639_v49 = vmul.f32 %v1601_v27, %v1601_v27 }
 0x37e   :  { %v1611_v51 = vsub.f32 %v1566_v22, %v625_v47  ;;  %654 = vadd.xlane.f32.xlu0 %v640_v48  ;;  %652 = vadd.xlane.f32.xlu1 %v639_v49 }
 0x380   :  { %v641_v28 = vmul.f32 %v1611_v51, %v1611_v51 }
 0x382   :  { %656 = vadd.xlane.f32.xlu1 %v641_v28 }
 0x3f7   :  { %v643_v62 = vpop.xlane.xlu0 %642 }
 0x3f8   :  { %v658_v8 = vmul.f32 0.0078125, %v643_v62 }
 0x3fa   :  { %v666_v9 = vadd.f32 1e-05, %v658_v8 }
 0x3fb   :  { %v647_v10 = vpop.xlane.xlu0 %646  ;;  %v645_v2 = vpop.xlane.xlu1 %644 }
 0x3fc   :  { %1266 = vrsqrt.f32 %v666_v9  ;;  %v660_v1 = vmul.f32 0.0078125, %v647_v10  ;;  %v659_v11 = vmul.f32 0.0078125, %v645_v2 }
 0x3fe   :  { %v668_v15 = vadd.f32 1e-05, %v660_v1  ;;  %v667_v17 = vadd.f32 1e-05, %v659_v11 }
 0x3ff   :  { %v649_v3 = vpop.xlane.xlu1 %648 }
 0x400   :  { %1268 = vrsqrt.f32 %v668_v15  ;;  %v661_v21 = vmul.f32 0.0078125, %v649_v3 }
 0x401   :  { %1270 = vrsqrt.f32 %v667_v17 }
 0x402   :  { %v669_v4 = vadd.f32 1e-05, %v661_v21  ;;  %v1069_v21 = vld [vmem:[%s1701_s10] ss:$0 sm:$0xff] }
 0x403   :  { %v651_v6 = vpop.xlane.xlu0 %650 }
 0x404   :  { %1272 = vrsqrt.f32 %v669_v4  ;;  %v662_v24 = vmul.f32 0.0078125, %v651_v6 }
 0x406   :  { %v670_v25 = vadd.f32 1e-05, %v662_v24 }
 0x407   :  { %v655_v26 = vpop.xlane.xlu0 %654  ;;  %v653_v29 = vpop.xlane.xlu1 %652 }
 0x408   :  { %1274 = vrsqrt.f32 %v670_v25  ;;  %v664_v5 = vmul.f32 0.0078125, %v655_v26  ;;  %v663_v31 = vmul.f32 0.0078125, %v653_v29 }
 0x409   :  { %v1267_v12 = vpop.eup %1266 }
 0x40a   :  { %v672_v32 = vadd.f32 1e-05, %v664_v5  ;;  %v671_v33 = vadd.f32 1e-05, %v663_v31  ;;  %v682_v38 = vmul.f32 %v1267_v12, %v1570_v23  ;;  %v1068_v23 = vld [vmem:[%s1699_s8] ss:$0 sm:$0xff] }
 0x40b   :  { %v657_v37 = vpop.xlane.xlu1 %656 }
 0x40c   :  { %1276 = vrsqrt.f32 %v672_v32  ;;  %v665_v39 = vmul.f32 0.0078125, %v657_v37  ;;  %v696_v46 = vmul.f32 %v1067_v19, %v682_v38 }
 0x40d   :  { %v1269_v41 = vpop.eup %1268  ;;  %1278 = vrsqrt.f32 %v671_v33 }
 0x40e   :  { %v1271_v43 = vpop.eup %1270  ;;  %v673_v44 = vadd.f32 1e-05, %v665_v39  ;;  %v684_v45 = vmul.f32 %v1269_v41, %v1575_v30  ;;  %v710_v28 = vadd.f32 %v1068_v23, %v696_v46 }
 0x40f   :  { %v683_v20 = vmul.f32 %v1271_v43, %v1578_v7 }
 0x410   :  { %1280 = vrsqrt.f32 %v673_v44  ;;  %v698_v50 = vmul.f32 %v1067_v19, %v684_v45 }
 0x411   :  { %v1273_v47 = vpop.eup %1272  ;;  %v697_v48 = vmul.f32 %v1067_v19, %v683_v20 }
 0x412   :  { %v685_v49 = vmul.f32 %v1273_v47, %v1585_v34  ;;  %v712_v40 = vadd.f32 %v1068_v23, %v698_v50 }
 0x413   :  { %v711_v52 = vadd.f32 %v1068_v23, %v697_v48 }
 0x414   :  { %v699_v53 = vmul.f32 %v1067_v19, %v685_v49 }
 0x415   :  { %v1275_v54 = vpop.eup %1274  ;;  %v718_v36 = vpack.c.bf16 %v711_v52, %v710_v28 }
 0x416   :  { %v713_v30 = vadd.f32 %v1068_v23, %v699_v53  ;;  %v686_v7 = vmul.f32 %v1275_v54, %v1590_v42 }
 0x417   :  { %1191 = vmatprep.mubr.bf16.mxu0 %v718_v36 }
 0x418   :  { %v719_v55 = vpack.c.bf16 %v713_v30, %v712_v40  ;;  %v700_v34 = vmul.f32 %v1067_v19, %v686_v7 }
 0x419   :  { %v1277_v56 = vpop.eup %1276 }
 0x41a   :  { %v1279_v59 = vpop.eup %1278  ;;  %1192 = vmatmul.mubr.bf16.vlgmr.msra.gmra.mxu0 %v719_v55  ;;  %v688_v60 = vmul.f32 %v1277_v56, %v1593_v13  ;;  %v714_v10 = vadd.f32 %v1068_v23, %v700_v34  ;;  %v1247_v13 = vld [vmem:[%s1702_s11 + $0x10] sm:$0xff]   ;;  %v1078_v56 = vld [vmem:[%s1703_s12] ss:$0 sm:$0xff]  ;;  %s1332_s12 = smov [#allocation5]  }
 0x41b   :  { %v687_v61 = vmul.f32 %v1279_v59, %v1601_v27  ;;  %1209 = vmatprep.subr.bf16.mxu1 %v1247_v13  ;;  %v1248_v27 = vld [vmem:[%s1702_s11 + $0x8] sm:$0xff]   ;;  %s1043_s21 = sshll.u32 %s1332_s12, 4  ;;  %s1044_s21 = int_to_ptr.vmem [resolvable:$true] %s1043_s21 }
 0x41c   :  { %v702_v9 = vmul.f32 %v1067_v19, %v688_v60  ;;  %1210 = vmatpush3.bf16.msra.mxu1 %v1247_v13  ;;  %s1302_s4 = scalar_lea.vmem %s1044_s21, 1024  ;;  %p1307_p6 = scmp.lt.s32.totalorder %s1044_s21, %s1044_s21 }
 0x41d   :  { %v1281_v0 = vpop.eup %1280  ;;  %v701_v62 = vmul.f32 %v1067_v19, %v687_v61  ;;  %1211 = vmatprep.subr.bf16.mxu1 %v1248_v27  ;;  %p1303_p5 = scmp.ne.s32.totalorder %s1044_s21, %s1302_s4  ;;  %p1308_p7 = scmp.lt.s32.totalorder %s1302_s4, %s1302_s4 }
 0x41e   :  { %v689_v8 = vmul.f32 %v1281_v0, %v1611_v51  ;;  %v716_v15 = vadd.f32 %v1068_v23, %v702_v9  ;;  %v1249_v51 = vld [vmem:[%s1702_s11] sm:$0xff]  }
 0x41f   :  { %v715_v2 = vadd.f32 %v1068_v23, %v701_v62  ;;  %p1309_p8 = por %p1308_p7, %p1307_p6 }
 0x420   :  { %v703_v1 = vmul.f32 %v1067_v19, %v689_v8  ;;  %1212 = vmatpush3.bf16.msra.mxu1 %v1248_v27 }
 0x421   :  { %v720_v11 = vpack.c.bf16 %v715_v2, %v714_v10  ;;  %1213 = vmatprep.subr.bf16.mxu1 %v1249_v51  ;;  %p1310_p9 = pnand %p1309_p8, %p1303_p5 }
 0x422   :  { %v717_v42 = vadd.f32 %v1068_v23, %v703_v1 }
 0x423   :  { %1195 = vmatprep.mubr.bf16.mxu0 %v720_v11 }
 0x424   :  { %v721_v17 = vpack.c.bf16 %v717_v42, %v716_v15  ;;  %1214 = vmatpush3.bf16.msra.mxu1 %v1249_v51 }
 0x426   :  { %1196 = vmatmul.mubr.bf16.gmra.mxu0 %v721_v17 }
 0x4da   :  { %v1193_v3 = vpop.f32.mrf.mxu0 }
 0x4db   :  { %v836_v24 = vadd.f32 %v1193_v3, %v1069_v21 }
 0x4dc   :  { %v827_v4 = vpop.f32.mrf.mxu0 }
 0x4dd   :  { %v828_v6 = vadd.f32 %v1069_v21, %v827_v4  ;;  %v868_v32 = vmul.f32 0.2, %v836_v24  ;;  %vm860_vm12 = vcmp.ge.f32.partialorder %v836_v24, 0.0 }
 0x4de   :  { %v1194_v25 = vpop.f32.mrf.mxu0 }
 0x4df   :  { %v839_v26 = vadd.f32 %v1194_v25, %v1069_v21  ;;  %v866_v5 = vmul.f32 0.2, %v828_v6  ;;  %vm858_vm11 = vcmp.ge.f32.partialorder %v828_v6, 0.0  ;;  %v876_v19 = vsel %vm860_vm12, %v836_v24, %v868_v32 }
 0x4e0   :  { %v830_v29 = vpop.f32.mrf.mxu0 }
 0x4e1   :  { %vm861_vm10 = vcmp.ge.f32.partialorder %v839_v26, 0.0  ;;  %v869_v31 = vmul.f32 0.2, %v839_v26  ;;  %v831_v12 = vadd.f32 %v1069_v21, %v830_v29  ;;  %v874_v38 = vsel %vm858_vm11, %v828_v6, %v866_v5 }
 0x4e3   :  { %vm859_vm13 = vcmp.ge.f32.partialorder %v831_v12, 0.0  ;;  %v867_v33 = vmul.f32 0.2, %v831_v12  ;;  %v877_v37 = vsel %vm861_vm10, %v839_v26, %v869_v31 }
 0x4e4   :  { %v883_v44 = vpack.c.bf16 %v877_v37, %v876_v19 }
 0x4e5   :  { %v875_v39 = vsel %vm859_vm13, %v831_v12, %v867_v33 }
 0x4e6   :  { %v1197_v41 = vpop.f32.mrf.mxu0  ;;  %v882_v43 = vpack.c.bf16 %v875_v39, %v874_v38 }
 0x4e7   :  { %v852_v46 = vadd.f32 %v1197_v41, %v1069_v21 }
 0x4e8   :  { %v843_v45 = vpop.f32.mrf.mxu0  ;;  %1215 = vmatprep.mubr.bf16.mxu1 %v882_v43 }
 0x4e9   :  { %v844_v20 = vadd.f32 %v1069_v21, %v843_v45  ;;  %1216 = vmatmul.mubr.bf16.vlgmr.msra.gmra.mxu1 %v883_v44  ;;  %v872_v52 = vmul.f32 0.2, %v852_v46  ;;  %vm864_vm0 = vcmp.ge.f32.partialorder %v852_v46, 0.0 }
 0x4ea   :  { %v1198_v23 = vpop.f32.mrf.mxu0 }
 0x4eb   :  { %v855_v47 = vadd.f32 %v1198_v23, %v1069_v21  ;;  %v870_v49 = vmul.f32 0.2, %v844_v20  ;;  %vm862_vm15 = vcmp.ge.f32.partialorder %v844_v20, 0.0  ;;  %v880_v7 = vsel %vm864_vm0, %v852_v46, %v872_v52 }
 0x4ec   :  { %v846_v48 = vpop.f32.mrf.mxu0 }
 0x4ed   :  { %vm865_vm14 = vcmp.ge.f32.partialorder %v855_v47, 0.0  ;;  %v873_v50 = vmul.f32 0.2, %v855_v47  ;;  %v847_v28 = vadd.f32 %v1069_v21, %v846_v48  ;;  %v878_v36 = vsel %vm862_vm15, %v844_v20, %v870_v49 }
 0x4ef   :  { %vm863_vm1 = vcmp.ge.f32.partialorder %v847_v28, 0.0  ;;  %v871_v53 = vmul.f32 0.2, %v847_v28  ;;  %v881_v54 = vsel %vm865_vm14, %v855_v47, %v873_v50 }
 0x4f0   :  { %v885_v55 = vpack.c.bf16 %v881_v54, %v880_v7 }
 0x4f1   :  { %v879_v40 = vsel %vm863_vm1, %v847_v28, %v871_v53 }
 0x4f2   :  { %v884_v30 = vpack.c.bf16 %v879_v40, %v878_v36 }
 0x4f4   :  { %1219 = vmatprep.mubr.bf16.mxu1 %v884_v30 }
 0x4f5   :  { %1220 = vmatmul.mubr.bf16.gmra.mxu1 %v885_v55 }
 0x5a9   :  { %v1217_v59 = vpop.f32.mrf.mxu1 }
 0x5aa   :  { %v1000_v60 = vadd.f32 %v1217_v59, %v1078_v56 }
 0x5ab   :  { %v991_v61 = vpop.f32.mrf.mxu1 }
 0x5ac   :  { %v1024_v34 = vadd.f32 %v1000_v60, %v1545_v58  ;;  %v992_v0 = vadd.f32 %v1078_v56, %v991_v61 }
 0x5ad   :  { %v1218_v62 = vpop.f32.mrf.mxu1 }
 0x5ae   :  { %1032 = vst [vmem:[#allocation5 + $0x10] sm:$0xff] %v1024_v34  ;;  %v1022_v8 = vadd.f32 %v992_v0, %v1538_v35  ;;  %v1003_v9 = vadd.f32 %v1218_v62, %v1078_v56 }
 0x5af   :  { %v994_v10 = vpop.f32.mrf.mxu1 }
 0x5b0   :  { %1030 = vst [vmem:[#allocation5] sm:$0xff] %v1022_v8  ;;  %v1025_v2 = vadd.f32 %v1003_v9, %v1550_v63  ;;  %v995_v1 = vadd.f32 %v1078_v56, %v994_v10 }
 0x5b2   :  { %1033 = vst [vmem:[#allocation5 + $0x18] sm:$0xff] %v1025_v2  ;;  %v1023_v11 = vadd.f32 %v995_v1, %v1542_v57 }
 0x5b4   :  { %1031 = vst [vmem:[#allocation5 + $0x8] sm:$0xff] %v1023_v11 }
 0x5b5   :  { %v1221_v15 = vpop.f32.mrf.mxu1 }
 0x5b6   :  { %v1016_v42 = vadd.f32 %v1221_v15, %v1078_v56 }
 0x5b7   :  { %v1007_v17 = vpop.f32.mrf.mxu1 }
 0x5b8   :  { %v1028_v58 = vadd.f32 %v1016_v42, %v1557_v16  ;;  %v1008_v13 = vadd.f32 %v1078_v56, %v1007_v17 }
 0x5b9   :  { %v1222_v27 = vpop.f32.mrf.mxu1 }
 0x5ba   :  { %1036 = vst [vmem:[#allocation5 + $0x30] sm:$0xff] %v1028_v58  ;;  %v1026_v35 = vadd.f32 %v1008_v13, %v1554_v14  ;;  %v1019_v51 = vadd.f32 %v1222_v27, %v1078_v56 }
 0x5bb   :  { %v1010_v3 = vpop.f32.mrf.mxu1 }
 0x5bc   :  { %1034 = vst [vmem:[#allocation5 + $0x20] sm:$0xff] %v1026_v35  ;;  %v1029_v63 = vadd.f32 %v1019_v51, %v1566_v22  ;;  %v1011_v21 = vadd.f32 %v1078_v56, %v1010_v3 }
 0x5be   :  { %1037 = vst [vmem:[#allocation5 + $0x38] sm:$0xff] %v1029_v63  ;;  %v1027_v57 = vadd.f32 %v1011_v21, %v1562_v18 }
 0x5c0   :  { %1035 = vst [vmem:[#allocation5 + $0x28] sm:$0xff] %v1027_v57 }
 0x5c1   :  { %1313 = shalt.err (!%p1310_p9)
}
 0x5c2   :  { %1049 = dma.vmem_to_hbm [thread:$0]  %s1044_s21, 1024, %s1704_s13, [#allocation4], %s1327_s28, %s1327_s28, %s1328_s29  }
 0x5c3   :  { %1324 = dma.done.wait [#allocation4], 1024  }
 0x5c4   :  { %1325 = vsyncadd [#allocation4], 4294966272 }
 0x5c5   :  { %1053 = vsyncpa [#allocation3], 1 }
 0x5c6   :  { %1054 = vsyncpa [#allocation4], 1 }

// kernel: tpu_custom_call.1
= control target key start
LH: loop header
LB: loop body
LE: loop exit
PB: predicated region body
PF: predicated region fallthrough
CT: control target
= control target key end

     0   :  { %18 = vsyncpa [#allocation3], 0  ;;  %s1691_s0 = inlined_call_operand.hbm [shape: f32[4,16,128], index: 0, kind: input, shape index: {}, may-alias: {0,13}]   ;;  %s1692_s1 = inlined_call_operand.vmem [shape: f32[1,128], index: 1, kind: input, shape index: {}]   ;;  %s1693_s2 = inlined_call_operand.vmem [shape: f32[1,128], index: 2, kind: input, shape index: {}]   ;;  %s1694_s3 = inlined_call_operand.vmem [shape: bf16[16,16], index: 3, kind: input, shape index: {}]   ;;  %s1695_s4 = inlined_call_operand.vmem [shape: f32[16,1], index: 4, kind: input, shape index: {}]   ;;  %s1696_s5 = inlined_call_operand.vmem [shape: bf16[16,16], index: 5, kind: input, shape index: {}]   ;;  %s1697_s6 = inlined_call_operand.vmem [shape: f32[16,1], index: 6, kind: input, shape index: {}]   ;;  %s1698_s7 = inlined_call_operand.vmem [shape: f32[1,128], index: 7, kind: input, shape index: {}]   ;;  %s1699_s8 = inlined_call_operand.vmem [shape: f32[1,128], index: 8, kind: input, shape index: {}]   ;;  %s1700_s9 = inlined_call_operand.vmem [shape: bf16[128,128], index: 9, kind: input, shape index: {}]   ;;  %s1701_s10 = inlined_call_operand.vmem [shape: f32[1,128], index: 10, kind: input, shape index: {}]   ;;  %s1702_s11 = inlined_call_operand.vmem [shape: bf16[128,128], index: 11, kind: input, shape index: {}]   ;;  %s1703_s12 = inlined_call_operand.vmem [shape: f32[1,128], index: 12, kind: input, shape index: {}]   ;;  %s1704_s13 = inlined_call_operand.hbm [shape: f32[4,16,128], index: 13, kind: output, shape index: {}, may-alias: {0,13}]  }
   0x1   :  { %19 = vsyncpa [#allocation4], 0  ;;  %s1326_s25 = smov [#allocation2]  }
   0x2   :  { %s25_s26 = sshll.u32 %s1326_s25, 4  ;;  %s26_s26 = int_to_ptr.vmem [resolvable:$true] %s25_s26 }
   0x3   :  { %s1290_s27 = scalar_lea.vmem %s26_s26, 1024  ;;  %p1295_p1 = scmp.lt.s32.totalorder %s26_s26, %s26_s26 }
   0x4   :  { %p1291_p0 = scmp.ne.s32.totalorder %s26_s26, %s1290_s27  ;;  %p1296_p2 = scmp.lt.s32.totalorder %s1290_s27, %s1290_s27 }
   0x6   :  { %p1297_p3 = por %p1296_p2, %p1295_p1 }
   0x8   :  { %p1298_p4 = pnand %p1297_p3, %p1291_p0 }
   0xa   :  { %1301 = shalt.err (!%p1298_p4)
}
   0xb   :  { %s1327_s28 = smov 128   ;;  %s1328_s29 = smov 8  }
   0xc   :  { %31 = dma.hbm_to_vmem [thread:$0]  %s1691_s0, 1024, %s26_s26, [#allocation3], %s1327_s28, %s1327_s28, %s1328_s29  }
   0xd   :  { %1322 = dma.done.wait [#allocation3], 1024  }
   0xe   :  { %1323 = vsyncadd [#allocation3], 4294966272  ;;  %v1409_v0 = vld [vmem:[#allocation2] sm:$0xff]  ;;  %v1411_v1 = vld [vmem:[#allocation2 + $0x10] sm:$0xff]  ;;  %v1329_v40 = vmov 0.0   ;;  %vm1330_vm0 = vmmov 0  }
   0xf   :  { %70 = vadd.xlane.f32.xlu0 %v1409_v0  ;;  %74 = vadd.xlane.f32.xlu1 %v1411_v1  ;;  %v1415_v2 = vld [vmem:[#allocation2 + $0x8] sm:$0xff]  ;;  %v1417_v3 = vld [vmem:[#allocation2 + $0x18] sm:$0xff]  ;;  %v1419_v4 = vld [vmem:[#allocation2 + $0x20] sm:$0xff]  ;;  %v1331_v43 = vmov 0   ;;  %vm212_vm1 = vcmask 130048  }
  0x10   :  { %v1421_v5 = vld [vmem:[#allocation2 + $0x28] sm:$0xff]  ;;  %v1425_v6 = vld [vmem:[#allocation2 + $0x30] sm:$0xff]  ;;  %v1427_v7 = vld [vmem:[#allocation2 + $0x38] sm:$0xff]  ;;  %1127 = vmatprep.subr.bf16.mxu0 %v1329_v40  ;;  %1133 = vmatprep.subr.bf16.mxu1 %v1329_v40 }
  0x11   :  { %1129 = vmatprep.mubr.msk.bf16.mxu0 %vm1330_vm0, %v1329_v40  ;;  %1135 = vmatprep.mubr.msk.bf16.mxu1 %vm1330_vm0, %v1329_v40  ;;  %v196_v41 = vld [vmem:[%s1695_s4 + $0x8] sm:$0xff]  ;;  %v195_v42 = vld [vmem:[%s1695_s4] sm:$0xff] }
  0x12   :  { %1231 = vset.pattern.permute.xlu1 %v1331_v43  ;;  %1230 = vset.pattern.permute.xlu0 %v1331_v43  ;;  %v408_v44 = vld [vmem:[%s1697_s6] sm:$0xff]  ;;  %v409_v45 = vld [vmem:[%s1697_s6 + $0x8] sm:$0xff] }
  0x13   :  { %72 = vadd.xlane.f32.xlu0 %v1415_v2  ;;  %76 = vadd.xlane.f32.xlu1 %v1417_v3 }
  0x17   :  { %78 = vadd.xlane.f32.xlu0 %v1419_v4  ;;  %80 = vadd.xlane.f32.xlu1 %v1421_v5 }
  0x1b   :  { %82 = vadd.xlane.f32.xlu0 %v1425_v6  ;;  %84 = vadd.xlane.f32.xlu1 %v1427_v7 }
  0x98   :  { %v71_v8 = vpop.xlane.xlu0 %70  ;;  %v75_v9 = vpop.xlane.xlu1 %74 }
  0x99   :  { %v87_v10 = vmul.f32 0.0078125, %v71_v8  ;;  %v89_v11 = vmul.f32 0.0078125, %v75_v9 }
  0x9b   :  { %v1434_v12 = vsub.f32 %v1409_v0, %v87_v10  ;;  %v1437_v13 = vsub.f32 %v1411_v1, %v89_v11 }
  0x9c   :  { %v73_v14 = vpop.xlane.xlu0 %72  ;;  %v77_v15 = vpop.xlane.xlu1 %76 }
  0x9d   :  { %v88_v16 = vmul.f32 0.0078125, %v73_v14  ;;  %v103_v17 = vmul.f32 %v1434_v12, %v1434_v12  ;;  %v90_v18 = vmul.f32 0.0078125, %v77_v15  ;;  %v105_v21 = vmul.f32 %v1437_v13, %v1437_v13 }
  0x9f   :  { %v1442_v19 = vsub.f32 %v1415_v2, %v88_v16  ;;  %111 = vadd.xlane.f32.xlu0 %v103_v17  ;;  %v1445_v20 = vsub.f32 %v1417_v3, %v90_v18  ;;  %v1055_v18 = vld [vmem:[%s1692_s1] ss:$0 sm:$0xff] }
  0xa0   :  { %v79_v22 = vpop.xlane.xlu0 %78  ;;  %v81_v23 = vpop.xlane.xlu1 %80 }
  0xa1   :  { %v91_v24 = vmul.f32 0.0078125, %v79_v22  ;;  %v104_v25 = vmul.f32 %v1442_v19, %v1442_v19  ;;  %v92_v26 = vmul.f32 0.0078125, %v81_v23  ;;  %v106_v29 = vmul.f32 %v1445_v20, %v1445_v20 }
  0xa3   :  { %v1452_v27 = vsub.f32 %v1419_v4, %v91_v24  ;;  %115 = vadd.xlane.f32.xlu0 %v105_v21  ;;  %113 = vadd.xlane.f32.xlu1 %v104_v25  ;;  %v1455_v28 = vsub.f32 %v1421_v5, %v92_v26  ;;  %v1056_v25 = vld [vmem:[%s1693_s2] ss:$0 sm:$0xff] }
  0xa4   :  { %v83_v30 = vpop.xlane.xlu0 %82  ;;  %v85_v31 = vpop.xlane.xlu1 %84 }
  0xa5   :  { %v93_v32 = vmul.f32 0.0078125, %v83_v30  ;;  %v107_v33 = vmul.f32 %v1452_v27, %v1452_v27  ;;  %v94_v34 = vmul.f32 0.0078125, %v85_v31  ;;  %v108_v37 = vmul.f32 %v1455_v28, %v1455_v28 }
  0xa7   :  { %v1462_v35 = vsub.f32 %v1425_v6, %v93_v32  ;;  %117 = vadd.xlane.f32.xlu1 %v106_v29  ;;  %119 = vadd.xlane.f32.xlu0 %v107_v33  ;;  %v1465_v36 = vsub.f32 %v1427_v7, %v94_v34 }
  0xa9   :  { %v109_v38 = vmul.f32 %v1462_v35, %v1462_v35  ;;  %v110_v39 = vmul.f32 %v1465_v36, %v1465_v36 }
  0xab   :  { %121 = vadd.xlane.f32.xlu1 %v108_v37  ;;  %123 = vadd.xlane.f32.xlu0 %v109_v38 }
  0xaf   :  { %125 = vadd.xlane.f32.xlu1 %v110_v39 }
  0xc0   :  { %204 = vperm.xlu1 %1231, %v196_v41   ;;  %v1232_v41 = vld [vmem:[%s1694_s3] sm:$0xff]  }
  0xc1   :  { %199 = vperm.xlu0 %1230, %v195_v42  }
  0xc4   :  { %412 = vperm.xlu1 %1231, %v408_v44  }
  0xc8   :  { %417 = vperm.xlu1 %1231, %v409_v45  }
 0x128   :  { %v112_v46 = vpop.xlane.xlu0 %111 }
 0x129   :  { %v127_v47 = vmul.f32 0.0078125, %v112_v46 }
 0x12b   :  { %v135_v48 = vadd.f32 1e-05, %v127_v47 }
 0x12c   :  { %v114_v49 = vpop.xlane.xlu1 %113  ;;  %v116_v50 = vpop.xlane.xlu0 %115 }
 0x12d   :  { %1250 = vrsqrt.f32 %v135_v48  ;;  %v128_v51 = vmul.f32 0.0078125, %v114_v49  ;;  %v129_v52 = vmul.f32 0.0078125, %v116_v50 }
 0x12f   :  { %v136_v53 = vadd.f32 1e-05, %v128_v51  ;;  %v137_v54 = vadd.f32 1e-05, %v129_v52 }
 0x130   :  { %v118_v55 = vpop.xlane.xlu1 %117  ;;  %v120_v56 = vpop.xlane.xlu0 %119 }
 0x131   :  { %1252 = vrsqrt.f32 %v136_v53  ;;  %v130_v57 = vmul.f32 0.0078125, %v118_v55  ;;  %v131_v58 = vmul.f32 0.0078125, %v120_v56 }
 0x132   :  { %1254 = vrsqrt.f32 %v137_v54 }
 0x133   :  { %v138_v59 = vadd.f32 1e-05, %v130_v57  ;;  %v139_v60 = vadd.f32 1e-05, %v131_v58 }
 0x134   :  { %v122_v61 = vpop.xlane.xlu1 %121  ;;  %v124_v62 = vpop.xlane.xlu0 %123 }
 0x135   :  { %1256 = vrsqrt.f32 %v138_v59  ;;  %v132_v63 = vmul.f32 0.0078125, %v122_v61  ;;  %v133_v8 = vmul.f32 0.0078125, %v124_v62 }
 0x136   :  { %1258 = vrsqrt.f32 %v139_v60 }
 0x137   :  { %v140_v9 = vadd.f32 1e-05, %v132_v63  ;;  %v141_v10 = vadd.f32 1e-05, %v133_v8 }
 0x138   :  { %v126_v11 = vpop.xlane.xlu1 %125 }
 0x139   :  { %1260 = vrsqrt.f32 %v140_v9  ;;  %v134_v14 = vmul.f32 0.0078125, %v126_v11 }
 0x13a   :  { %v1251_v15 = vpop.eup %1250  ;;  %1262 = vrsqrt.f32 %v141_v10 }
 0x13b   :  { %v142_v16 = vadd.f32 1e-05, %v134_v14  ;;  %v151_v17 = vmul.f32 %v1251_v15, %v1434_v12 }
 0x13c   :  { %v205_v58 = vpop.permute.xlu1 %204 }
 0x13d   :  { %1264 = vrsqrt.f32 %v142_v16  ;;  %v165_v24 = vmul.f32 %v1055_v18, %v151_v17 }
 0x13e   :  { %v1253_v21 = vpop.eup %1252 }
 0x13f   :  { %v1255_v22 = vpop.eup %1254  ;;  %v152_v23 = vmul.f32 %v1253_v21, %v1442_v19  ;;  %v179_v12 = vadd.f32 %v1056_v25, %v165_v24 }
 0x140   :  { %v153_v26 = vmul.f32 %v1255_v22, %v1437_v13 }
 0x141   :  { %v166_v29 = vmul.f32 %v1055_v18, %v152_v23 }
 0x142   :  { %v1257_v30 = vpop.eup %1256  ;;  %v167_v34 = vmul.f32 %v1055_v18, %v153_v26  ;;  %v1233_v26 = vld [vmem:[%s1696_s5] sm:$0xff]  }
 0x143   :  { %v1259_v31 = vpop.eup %1258  ;;  %v180_v32 = vadd.f32 %v1056_v25, %v166_v29  ;;  %v154_v33 = vmul.f32 %v1257_v30, %v1445_v20 }
 0x144   :  { %v155_v37 = vmul.f32 %v1259_v31, %v1452_v27  ;;  %v181_v13 = vadd.f32 %v1056_v25, %v167_v34 }
 0x145   :  { %v187_v38 = vpack.c.bf16 %v180_v32, %v179_v12  ;;  %v168_v39 = vmul.f32 %v1055_v18, %v154_v33 }
 0x146   :  { %v1261_v19 = vpop.eup %1260  ;;  %v169_v42 = vmul.f32 %v1055_v18, %v155_v37 }
 0x147   :  { %v1263_v43 = vpop.eup %1262  ;;  %1128 = vmatpush3.bf16.msra.mxu0 %v187_v38  ;;  %v182_v44 = vadd.f32 %v1056_v25, %v168_v39  ;;  %v156_v45 = vmul.f32 %v1261_v19, %v1455_v28 }
 0x148   :  { %1139 = vmatprep.subr.bf16.mxu0 %v1329_v40  ;;  %v157_v20 = vmul.f32 %v1263_v43, %v1462_v35  ;;  %v183_v48 = vadd.f32 %v1056_v25, %v169_v42 }
 0x149   :  { %v188_v27 = vpack.c.bf16 %v182_v44, %v181_v13  ;;  %v170_v46 = vmul.f32 %v1055_v18, %v156_v45 }
 0x14a   :  { %v1265_v47 = vpop.eup %1264  ;;  %1130 = vmatmul.mubr.msk.bf16.vlgmr.msra.gmra.mxu0 %vm212_vm1, %v1232_v41  ;;  %v171_v51 = vmul.f32 %v1055_v18, %v157_v20 }
 0x14b   :  { %1134 = vmatpush3.bf16.msra.mxu1 %v188_v27  ;;  %v184_v49 = vadd.f32 %v1056_v25, %v170_v46  ;;  %1141 = vmatprep.mubr.msk.bf16.mxu0 %vm1330_vm0, %v1329_v40  ;;  %v158_v50 = vmul.f32 %v1265_v47, %v1465_v36  ;;  %v200_v36 = vpop.permute.xlu0 %199 }
 0x14c   :  { %1145 = vmatprep.subr.bf16.mxu1 %v1329_v40  ;;  %v185_v35 = vadd.f32 %v1056_v25, %v171_v51 }
 0x14d   :  { %v189_v28 = vpack.c.bf16 %v184_v49, %v183_v48  ;;  %v172_v52 = vmul.f32 %v1055_v18, %v158_v50  ;;  %v413_v49 = vpop.permute.xlu1 %412 }
 0x14e   :  { %1136 = vmatmul.mubr.msk.bf16.vlgmr.msra.gmra.mxu1 %vm212_vm1, %v1232_v41 }
 0x14f   :  { %1140 = vmatpush3.bf16.msra.mxu0 %v189_v28  ;;  %v186_v53 = vadd.f32 %v1056_v25, %v172_v52  ;;  %1147 = vmatprep.mubr.msk.bf16.mxu1 %vm1330_vm0, %v1329_v40 }
 0x150   :  { %1151 = vmatprep.subr.bf16.mxu0 %v1329_v40 }
 0x151   :  { %v190_v54 = vpack.c.bf16 %v186_v53, %v185_v35  ;;  %v418_v52 = vpop.permute.xlu1 %417 }
 0x152   :  { %1142 = vmatmul.mubr.msk.bf16.vlgmr.msra.gmra.mxu0 %vm212_vm1, %v1232_v41 }
 0x153   :  { %1146 = vmatpush3.bf16.msra.mxu1 %v190_v54  ;;  %1153 = vmatprep.mubr.msk.bf16.mxu0 %vm1330_vm0, %v1329_v40 }
 0x154   :  { %1157 = vmatprep.subr.bf16.mxu1 %v1329_v40 }
 0x156   :  { %1148 = vmatmul.mubr.msk.bf16.vlgmr.msra.gmra.mxu1 %vm212_vm1, %v1232_v41 }
 0x157   :  { %1159 = vmatprep.mubr.msk.bf16.mxu1 %vm1330_vm0, %v1329_v40 }
 0x20a   :  { %v250_v55 = vpop.f32.mrf.mxu0 }
 0x20b   :  { %v251_v56 = vadd.f32 %v250_v55, %v200_v36 }
 0x20c   :  { %v1131_v57 = vpop.f32.mrf.mxu0 }
 0x20d   :  { %v388_v59 = vmul.f32 0.2, %v251_v56  ;;  %vm380_vm2 = vcmp.ge.f32.partialorder %v251_v56, 0.0 }
 0x20e   :  { %v253_v60 = vpop.f32.mrf.mxu0  ;;  %v291_v61 = vpop.f32.mrf.mxu1 }
 0x20f   :  { %v254_v62 = vadd.f32 %v253_v60, %v205_v58  ;;  %v292_v63 = vadd.f32 %v291_v61, %v200_v36  ;;  %v396_v11 = vsel %vm380_vm2, %v251_v56, %v388_v59 }
 0x210   :  { %v1132_v8 = vpop.f32.mrf.mxu0  ;;  %v1137_v9 = vpop.f32.mrf.mxu1 }
 0x211   :  { %vm381_vm3 = vcmp.ge.f32.partialorder %v254_v62, 0.0  ;;  %v389_v10 = vmul.f32 0.2, %v254_v62  ;;  %v390_v14 = vmul.f32 0.2, %v292_v63  ;;  %vm382_vm4 = vcmp.ge.f32.partialorder %v292_v63, 0.0 }
 0x212   :  { %v294_v15 = vpop.f32.mrf.mxu1  ;;  %v332_v16 = vpop.f32.mrf.mxu0 }
 0x213   :  { %v397_v17 = vsel %vm381_vm3, %v254_v62, %v389_v10  ;;  %v295_v18 = vadd.f32 %v294_v15, %v205_v58  ;;  %v333_v21 = vadd.f32 %v332_v16, %v200_v36  ;;  %v398_v29 = vsel %vm382_vm4, %v292_v63, %v390_v14 }
 0x214   :  { %v404_v22 = vpack.c.bf16 %v397_v17, %v396_v11  ;;  %v1138_v23 = vpop.f32.mrf.mxu1  ;;  %v1143_v24 = vpop.f32.mrf.mxu0 }
 0x215   :  { %vm383_vm5 = vcmp.ge.f32.partialorder %v295_v18, 0.0  ;;  %v391_v25 = vmul.f32 0.2, %v295_v18  ;;  %v392_v32 = vmul.f32 0.2, %v333_v21  ;;  %vm384_vm6 = vcmp.ge.f32.partialorder %v333_v21, 0.0 }
 0x216   :  { %v335_v30 = vpop.f32.mrf.mxu0  ;;  %v373_v31 = vpop.f32.mrf.mxu1  ;;  %1152 = vmatpush3.bf16.msra.mxu0 %v404_v22 }
 0x217   :  { %v399_v12 = vsel %vm383_vm5, %v295_v18, %v391_v25  ;;  %v336_v33 = vadd.f32 %v335_v30, %v205_v58  ;;  %v374_v34 = vadd.f32 %v373_v31, %v200_v36  ;;  %1163 = vmatprep.subr.bf16.mxu0 %v1329_v40  ;;  %v400_v42 = vsel %vm384_vm6, %v333_v21, %v392_v32 }
 0x218   :  { %v405_v37 = vpack.c.bf16 %v399_v12, %v398_v29  ;;  %v1144_v38 = vpop.f32.mrf.mxu0  ;;  %v1149_v39 = vpop.f32.mrf.mxu1 }
 0x219   :  { %vm385_vm7 = vcmp.ge.f32.partialorder %v336_v33, 0.0  ;;  %v393_v19 = vmul.f32 0.2, %v336_v33  ;;  %1154 = vmatmul.mubr.msk.bf16.vlgmr.msra.gmra.mxu0 %vm212_vm1, %v1233_v26  ;;  %v394_v13 = vmul.f32 0.2, %v374_v34  ;;  %vm386_vm8 = vcmp.ge.f32.partialorder %v374_v34, 0.0 }
 0x21a   :  { %v376_v41 = vpop.f32.mrf.mxu1  ;;  %1158 = vmatpush3.bf16.msra.mxu1 %v405_v37  ;;  %1165 = vmatprep.mubr.msk.bf16.mxu0 %vm1330_vm0, %v1329_v40 }
 0x21b   :  { %v401_v43 = vsel %vm385_vm7, %v336_v33, %v393_v19  ;;  %v377_v44 = vadd.f32 %v376_v41, %v205_v58  ;;  %1169 = vmatprep.subr.bf16.mxu1 %v1329_v40  ;;  %v402_v46 = vsel %vm386_vm8, %v374_v34, %v394_v13 }
 0x21c   :  { %v406_v45 = vpack.c.bf16 %v401_v43, %v400_v42  ;;  %v1150_v20 = vpop.f32.mrf.mxu1 }
 0x21d   :  { %vm387_vm9 = vcmp.ge.f32.partialorder %v377_v44, 0.0  ;;  %v395_v27 = vmul.f32 0.2, %v377_v44  ;;  %1160 = vmatmul.mubr.msk.bf16.vlgmr.msra.gmra.mxu1 %vm212_vm1, %v1233_v26  ;;  %v1234_v20 = vld [vmem:[%s1700_s9 + $0x38] sm:$0xff]  }
 0x21e   :  { %1164 = vmatpush3.bf16.msra.mxu0 %v406_v45  ;;  %1171 = vmatprep.mubr.msk.bf16.mxu1 %vm1330_vm0, %v1329_v40 }
 0x21f   :  { %v403_v47 = vsel %vm387_vm9, %v377_v44, %v395_v27  ;;  %1175 = vmatprep.subr.bf16.mxu0 %v1234_v20 }
 0x220   :  { %v407_v48 = vpack.c.bf16 %v403_v47, %v402_v46 }
 0x221   :  { %1166 = vmatmul.mubr.msk.bf16.vlgmr.msra.gmra.mxu0 %vm212_vm1, %v1233_v26 }
 0x222   :  { %1170 = vmatpush3.bf16.msra.mxu1 %v407_v48  ;;  %1176 = vmatpush3.bf16.msra.mxu0 %v1234_v20 }
 0x225   :  { %1172 = vmatmul.mubr.msk.bf16.vlgmr.msra.gmra.mxu1 %vm212_vm1, %v1233_v26 }
 0x2d9   :  { %v462_v50 = vpop.f32.mrf.mxu0 }
 0x2da   :  { %v463_v51 = vadd.f32 %v462_v50, %v413_v49  ;;  %v1235_v50 = vld [vmem:[%s1700_s9 + $0x30] sm:$0xff]  }
 0x2db   :  { %v1155_v28 = vpop.f32.mrf.mxu0  ;;  %1177 = vmatprep.subr.bf16.mxu0 %v1235_v50 }
 0x2dc   :  { %v1538_v35 = vadd.f32 %v463_v51, %v1409_v0  ;;  %1178 = vmatpush3.bf16.msra.mxu0 %v1235_v50 }
 0x2dd   :  { %v465_v53 = vpop.f32.mrf.mxu0  ;;  %v503_v54 = vpop.f32.mrf.mxu1 }
 0x2de   :  { %v466_v36 = vadd.f32 %v465_v53, %v418_v52  ;;  %v504_v40 = vadd.f32 %v503_v54, %v413_v49  ;;  %602 = vadd.xlane.f32.xlu1 %v1538_v35  ;;  %v1237_v53 = vld [vmem:[%s1700_s9 + $0x20] sm:$0xff]   ;;  %v1238_v54 = vld [vmem:[%s1700_s9 + $0x18] sm:$0xff]  }
 0x2df   :  { %v1156_v55 = vpop.f32.mrf.mxu0  ;;  %v1161_v56 = vpop.f32.mrf.mxu1 }
 0x2e0   :  { %v1542_v57 = vadd.f32 %v466_v36, %v1415_v2  ;;  %v1545_v58 = vadd.f32 %v504_v40, %v1411_v1  ;;  %v1239_v36 = vld [vmem:[%s1700_s9 + $0x10] sm:$0xff]   ;;  %v1240_v40 = vld [vmem:[%s1700_s9 + $0x8] sm:$0xff]   ;;  %v1241_v55 = vld [vmem:[%s1700_s9] sm:$0xff]  }
 0x2e1   :  { %v506_v59 = vpop.f32.mrf.mxu1  ;;  %v544_v60 = vpop.f32.mrf.mxu0  ;;  %v1242_v56 = vld [vmem:[%s1702_s11 + $0x38] sm:$0xff]  }
 0x2e2   :  { %v507_v61 = vadd.f32 %v506_v59, %v418_v52  ;;  %606 = vadd.xlane.f32.xlu1 %v1545_v58  ;;  %604 = vadd.xlane.f32.xlu0 %v1542_v57  ;;  %v545_v8 = vadd.f32 %v544_v60, %v413_v49  ;;  %v1243_v59 = vld [vmem:[%s1702_s11 + $0x30] sm:$0xff]   ;;  %v1244_v60 = vld [vmem:[%s1702_s11 + $0x28] sm:$0xff]  }
 0x2e3   :  { %v1162_v0 = vpop.f32.mrf.mxu1  ;;  %v1167_v62 = vpop.f32.mrf.mxu0  ;;  %1199 = vmatprep.subr.bf16.mxu1 %v1242_v56 }
 0x2e4   :  { %v1550_v63 = vadd.f32 %v507_v61, %v1417_v3  ;;  %v1554_v14 = vadd.f32 %v545_v8, %v1419_v4  ;;  %1200 = vmatpush3.bf16.msra.mxu1 %v1242_v56  ;;  %v1245_v61 = vld [vmem:[%s1702_s11 + $0x20] sm:$0xff]   ;;  %v1246_v0 = vld [vmem:[%s1702_s11 + $0x18] sm:$0xff]  }
 0x2e5   :  { %v547_v9 = vpop.f32.mrf.mxu0  ;;  %v585_v10 = vpop.f32.mrf.mxu1  ;;  %1201 = vmatprep.subr.bf16.mxu1 %v1243_v59 }
 0x2e6   :  { %v586_v2 = vadd.f32 %v585_v10, %v413_v49  ;;  %608 = vadd.xlane.f32.xlu1 %v1550_v63  ;;  %v548_v15 = vadd.f32 %v547_v9, %v418_v52 }
 0x2e7   :  { %v1173_v1 = vpop.f32.mrf.mxu1  ;;  %v1168_v11 = vpop.f32.mrf.mxu0 }
 0x2e8   :  { %v1557_v16 = vadd.f32 %v586_v2, %v1425_v6  ;;  %v1562_v18 = vadd.f32 %v548_v15, %v1421_v5  ;;  %1202 = vmatpush3.bf16.msra.mxu1 %v1243_v59 }
 0x2e9   :  { %v588_v17 = vpop.f32.mrf.mxu1  ;;  %1203 = vmatprep.subr.bf16.mxu1 %v1244_v60 }
 0x2ea   :  { %614 = vadd.xlane.f32.xlu0 %v1557_v16  ;;  %610 = vadd.xlane.f32.xlu1 %v1554_v14  ;;  %v589_v21 = vadd.f32 %v588_v17, %v418_v52  ;;  %v1236_v52 = vld [vmem:[%s1700_s9 + $0x28] sm:$0xff]  }
 0x2eb   :  { %v1174_v3 = vpop.f32.mrf.mxu1  ;;  %1179 = vmatprep.subr.bf16.mxu0 %v1236_v52 }
 0x2ec   :  { %v1566_v22 = vadd.f32 %v589_v21, %v1427_v7  ;;  %1180 = vmatpush3.bf16.msra.mxu0 %v1236_v52  ;;  %1204 = vmatpush3.bf16.msra.mxu1 %v1244_v60 }
 0x2ed   :  { %1181 = vmatprep.subr.bf16.mxu0 %v1237_v53  ;;  %1205 = vmatprep.subr.bf16.mxu1 %v1245_v61 }
 0x2ee   :  { %612 = vadd.xlane.f32.xlu1 %v1562_v18 }
 0x2f0   :  { %1182 = vmatpush3.bf16.msra.mxu0 %v1237_v53  ;;  %1206 = vmatpush3.bf16.msra.mxu1 %v1245_v61 }
 0x2f1   :  { %1183 = vmatprep.subr.bf16.mxu0 %v1238_v54  ;;  %1207 = vmatprep.subr.bf16.mxu1 %v1246_v0 }
 0x2f2   :  { %616 = vadd.xlane.f32.xlu1 %v1566_v22 }
 0x2f4   :  { %1184 = vmatpush3.bf16.msra.mxu0 %v1238_v54  ;;  %1208 = vmatpush3.bf16.msra.mxu1 %v1246_v0 }
 0x2f5   :  { %1185 = vmatprep.subr.bf16.mxu0 %v1239_v36 }
 0x2f8   :  { %1186 = vmatpush3.bf16.msra.mxu0 %v1239_v36 }
 0x2f9   :  { %1187 = vmatprep.subr.bf16.mxu0 %v1240_v40 }
 0x2fc   :  { %1188 = vmatpush3.bf16.msra.mxu0 %v1240_v40 }
 0x2fd   :  { %1189 = vmatprep.subr.bf16.mxu0 %v1241_v55 }
 0x300   :  { %1190 = vmatpush3.bf16.msra.mxu0 %v1241_v55 }
 0x367   :  { %v603_v4 = vpop.xlane.xlu1 %602 }
 0x368   :  { %v618_v6 = vmul.f32 0.0078125, %v603_v4 }
 0x36a   :  { %v1570_v23 = vsub.f32 %v1538_v35, %v618_v6 }
 0x36b   :  { %v607_v24 = vpop.xlane.xlu1 %606  ;;  %v605_v25 = vpop.xlane.xlu0 %604 }
 0x36c   :  { %v620_v26 = vmul.f32 0.0078125, %v607_v24  ;;  %v619_v29 = vmul.f32 0.0078125, %v605_v25  ;;  %v634_v5 = vmul.f32 %v1570_v23, %v1570_v23 }
 0x36e   :  { %v1575_v30 = vsub.f32 %v1545_v58, %v620_v26  ;;  %v1578_v7 = vsub.f32 %v1542_v57, %v619_v29  ;;  %642 = vadd.xlane.f32.xlu0 %v634_v5 }
 0x36f   :  { %v609_v31 = vpop.xlane.xlu1 %608 }
 0x370   :  { %v621_v12 = vmul.f32 0.0078125, %v609_v31  ;;  %v636_v32 = vmul.f32 %v1575_v30, %v1575_v30  ;;  %v635_v33 = vmul.f32 %v1578_v7, %v1578_v7 }
 0x372   :  { %v1585_v34 = vsub.f32 %v1550_v63, %v621_v12  ;;  %646 = vadd.xlane.f32.xlu0 %v636_v32  ;;  %644 = vadd.xlane.f32.xlu1 %v635_v33 }
 0x373   :  { %v615_v37 = vpop.xlane.xlu0 %614  ;;  %v611_v38 = vpop.xlane.xlu1 %610 }
 0x374   :  { %v624_v39 = vmul.f32 0.0078125, %v615_v37  ;;  %v622_v19 = vmul.f32 0.0078125, %v611_v38  ;;  %v637_v41 = vmul.f32 %v1585_v34, %v1585_v34 }
 0x376   :  { %v1590_v42 = vsub.f32 %v1554_v14, %v622_v19  ;;  %648 = vadd.xlane.f32.xlu1 %v637_v41  ;;  %v1593_v13 = vsub.f32 %v1557_v16, %v624_v39  ;;  %v1067_v19 = vld [vmem:[%s1698_s7] ss:$0 sm:$0xff] }
 0x377   :  { %v613_v43 = vpop.xlane.xlu1 %612 }
 0x378   :  { %v623_v44 = vmul.f32 0.0078125, %v613_v43  ;;  %v638_v45 = vmul.f32 %v1590_v42, %v1590_v42  ;;  %v640_v48 = vmul.f32 %v1593_v13, %v1593_v13 }
 0x37a   :  { %v1601_v27 = vsub.f32 %v1562_v18, %v623_v44  ;;  %650 = vadd.xlane.f32.xlu0 %v638_v45 }
 0x37b   :  { %v617_v46 = vpop.xlane.xlu1 %616 }
 0x37c   :  { %v625_v47 = vmul.f32 0.0078125, %v617_v46  ;;  %v639_v49 = vmul.f32 %v1601_v27, %v1601_v27 }
 0x37e   :  { %v1611_v51 = vsub.f32 %v1566_v22, %v625_v47  ;;  %654 = vadd.xlane.f32.xlu0 %v640_v48  ;;  %652 = vadd.xlane.f32.xlu1 %v639_v49 }
 0x380   :  { %v641_v28 = vmul.f32 %v1611_v51, %v1611_v51 }
 0x382   :  { %656 = vadd.xlane.f32.xlu1 %v641_v28 }
 0x3f7   :  { %v643_v62 = vpop.xlane.xlu0 %642 }
 0x3f8   :  { %v658_v8 = vmul.f32 0.0078125, %v643_v62 }
 0x3fa   :  { %v666_v9 = vadd.f32 1e-05, %v658_v8 }
 0x3fb   :  { %v647_v10 = vpop.xlane.xlu0 %646  ;;  %v645_v2 = vpop.xlane.xlu1 %644 }
 0x3fc   :  { %1266 = vrsqrt.f32 %v666_v9  ;;  %v660_v1 = vmul.f32 0.0078125, %v647_v10  ;;  %v659_v11 = vmul.f32 0.0078125, %v645_v2 }
 0x3fe   :  { %v668_v15 = vadd.f32 1e-05, %v660_v1  ;;  %v667_v17 = vadd.f32 1e-05, %v659_v11 }
 0x3ff   :  { %v649_v3 = vpop.xlane.xlu1 %648 }
 0x400   :  { %1268 = vrsqrt.f32 %v668_v15  ;;  %v661_v21 = vmul.f32 0.0078125, %v649_v3 }
 0x401   :  { %1270 = vrsqrt.f32 %v667_v17 }
 0x402   :  { %v669_v4 = vadd.f32 1e-05, %v661_v21  ;;  %v1069_v21 = vld [vmem:[%s1701_s10] ss:$0 sm:$0xff] }
 0x403   :  { %v651_v6 = vpop.xlane.xlu0 %650 }
 0x404   :  { %1272 = vrsqrt.f32 %v669_v4  ;;  %v662_v24 = vmul.f32 0.0078125, %v651_v6 }
 0x406   :  { %v670_v25 = vadd.f32 1e-05, %v662_v24 }
 0x407   :  { %v655_v26 = vpop.xlane.xlu0 %654  ;;  %v653_v29 = vpop.xlane.xlu1 %652 }
 0x408   :  { %1274 = vrsqrt.f32 %v670_v25  ;;  %v664_v5 = vmul.f32 0.0078125, %v655_v26  ;;  %v663_v31 = vmul.f32 0.0078125, %v653_v29 }
 0x409   :  { %v1267_v12 = vpop.eup %1266 }
 0x40a   :  { %v672_v32 = vadd.f32 1e-05, %v664_v5  ;;  %v671_v33 = vadd.f32 1e-05, %v663_v31  ;;  %v682_v38 = vmul.f32 %v1267_v12, %v1570_v23  ;;  %v1068_v23 = vld [vmem:[%s1699_s8] ss:$0 sm:$0xff] }
 0x40b   :  { %v657_v37 = vpop.xlane.xlu1 %656 }
 0x40c   :  { %1276 = vrsqrt.f32 %v672_v32  ;;  %v665_v39 = vmul.f32 0.0078125, %v657_v37  ;;  %v696_v46 = vmul.f32 %v1067_v19, %v682_v38 }
 0x40d   :  { %v1269_v41 = vpop.eup %1268  ;;  %1278 = vrsqrt.f32 %v671_v33 }
 0x40e   :  { %v1271_v43 = vpop.eup %1270  ;;  %v673_v44 = vadd.f32 1e-05, %v665_v39  ;;  %v684_v45 = vmul.f32 %v1269_v41, %v1575_v30  ;;  %v710_v28 = vadd.f32 %v1068_v23, %v696_v46 }
 0x40f   :  { %v683_v20 = vmul.f32 %v1271_v43, %v1578_v7 }
 0x410   :  { %1280 = vrsqrt.f32 %v673_v44  ;;  %v698_v50 = vmul.f32 %v1067_v19, %v684_v45 }
 0x411   :  { %v1273_v47 = vpop.eup %1272  ;;  %v697_v48 = vmul.f32 %v1067_v19, %v683_v20 }
 0x412   :  { %v685_v49 = vmul.f32 %v1273_v47, %v1585_v34  ;;  %v712_v40 = vadd.f32 %v1068_v23, %v698_v50 }
 0x413   :  { %v711_v52 = vadd.f32 %v1068_v23, %v697_v48 }
 0x414   :  { %v699_v53 = vmul.f32 %v1067_v19, %v685_v49 }
 0x415   :  { %v1275_v54 = vpop.eup %1274  ;;  %v718_v36 = vpack.c.bf16 %v711_v52, %v710_v28 }
 0x416   :  { %v713_v30 = vadd.f32 %v1068_v23, %v699_v53  ;;  %v686_v7 = vmul.f32 %v1275_v54, %v1590_v42 }
 0x417   :  { %1191 = vmatprep.mubr.bf16.mxu0 %v718_v36 }
 0x418   :  { %v719_v55 = vpack.c.bf16 %v713_v30, %v712_v40  ;;  %v700_v34 = vmul.f32 %v1067_v19, %v686_v7 }
 0x419   :  { %v1277_v56 = vpop.eup %1276 }
 0x41a   :  { %v1279_v59 = vpop.eup %1278  ;;  %1192 = vmatmul.mubr.bf16.vlgmr.msra.gmra.mxu0 %v719_v55  ;;  %v688_v60 = vmul.f32 %v1277_v56, %v1593_v13  ;;  %v714_v10 = vadd.f32 %v1068_v23, %v700_v34  ;;  %v1247_v13 = vld [vmem:[%s1702_s11 + $0x10] sm:$0xff]   ;;  %v1078_v56 = vld [vmem:[%s1703_s12] ss:$0 sm:$0xff]  ;;  %s1332_s12 = smov [#allocation5]  }
 0x41b   :  { %v687_v61 = vmul.f32 %v1279_v59, %v1601_v27  ;;  %1209 = vmatprep.subr.bf16.mxu1 %v1247_v13  ;;  %v1248_v27 = vld [vmem:[%s1702_s11 + $0x8] sm:$0xff]   ;;  %s1043_s21 = sshll.u32 %s1332_s12, 4  ;;  %s1044_s21 = int_to_ptr.vmem [resolvable:$true] %s1043_s21 }
 0x41c   :  { %v702_v9 = vmul.f32 %v1067_v19, %v688_v60  ;;  %1210 = vmatpush3.bf16.msra.mxu1 %v1247_v13  ;;  %s1302_s4 = scalar_lea.vmem %s1044_s21, 1024  ;;  %p1307_p6 = scmp.lt.s32.totalorder %s1044_s21, %s1044_s21 }
 0x41d   :  { %v1281_v0 = vpop.eup %1280  ;;  %v701_v62 = vmul.f32 %v1067_v19, %v687_v61  ;;  %1211 = vmatprep.subr.bf16.mxu1 %v1248_v27  ;;  %p1303_p5 = scmp.ne.s32.totalorder %s1044_s21, %s1302_s4  ;;  %p1308_p7 = scmp.lt.s32.totalorder %s1302_s4, %s1302_s4 }
 0x41e   :  { %v689_v8 = vmul.f32 %v1281_v0, %v1611_v51  ;;  %v716_v15 = vadd.f32 %v1068_v23, %v702_v9  ;;  %v1249_v51 = vld [vmem:[%s1702_s11] sm:$0xff]  }
 0x41f   :  { %v715_v2 = vadd.f32 %v1068_v23, %v701_v62  ;;  %p1309_p8 = por %p1308_p7, %p1307_p6 }
 0x420   :  { %v703_v1 = vmul.f32 %v1067_v19, %v689_v8  ;;  %1212 = vmatpush3.bf16.msra.mxu1 %v1248_v27 }
 0x421   :  { %v720_v11 = vpack.c.bf16 %v715_v2, %v714_v10  ;;  %1213 = vmatprep.subr.bf16.mxu1 %v1249_v51  ;;  %p1310_p9 = pnand %p1309_p8, %p1303_p5 }
 0x422   :  { %v717_v42 = vadd.f32 %v1068_v23, %v703_v1 }
 0x423   :  { %1195 = vmatprep.mubr.bf16.mxu0 %v720_v11 }
 0x424   :  { %v721_v17 = vpack.c.bf16 %v717_v42, %v716_v15  ;;  %1214 = vmatpush3.bf16.msra.mxu1 %v1249_v51 }
 0x426   :  { %1196 = vmatmul.mubr.bf16.gmra.mxu0 %v721_v17 }
 0x4da   :  { %v1193_v3 = vpop.f32.mrf.mxu0 }
 0x4db   :  { %v836_v24 = vadd.f32 %v1193_v3, %v1069_v21 }
 0x4dc   :  { %v827_v4 = vpop.f32.mrf.mxu0 }
 0x4dd   :  { %v828_v6 = vadd.f32 %v1069_v21, %v827_v4  ;;  %v868_v32 = vmul.f32 0.2, %v836_v24  ;;  %vm860_vm12 = vcmp.ge.f32.partialorder %v836_v24, 0.0 }
 0x4de   :  { %v1194_v25 = vpop.f32.mrf.mxu0 }
 0x4df   :  { %v839_v26 = vadd.f32 %v1194_v25, %v1069_v21  ;;  %v866_v5 = vmul.f32 0.2, %v828_v6  ;;  %vm858_vm11 = vcmp.ge.f32.partialorder %v828_v6, 0.0  ;;  %v876_v19 = vsel %vm860_vm12, %v836_v24, %v868_v32 }
 0x4e0   :  { %v830_v29 = vpop.f32.mrf.mxu0 }
 0x4e1   :  { %vm861_vm10 = vcmp.ge.f32.partialorder %v839_v26, 0.0  ;;  %v869_v31 = vmul.f32 0.2, %v839_v26  ;;  %v831_v12 = vadd.f32 %v1069_v21, %v830_v29  ;;  %v874_v38 = vsel %vm858_vm11, %v828_v6, %v866_v5 }
 0x4e3   :  { %vm859_vm13 = vcmp.ge.f32.partialorder %v831_v12, 0.0  ;;  %v867_v33 = vmul.f32 0.2, %v831_v12  ;;  %v877_v37 = vsel %vm861_vm10, %v839_v26, %v869_v31 }
 0x4e4   :  { %v883_v44 = vpack.c.bf16 %v877_v37, %v876_v19 }
 0x4e5   :  { %v875_v39 = vsel %vm859_vm13, %v831_v12, %v867_v33 }
 0x4e6   :  { %v1197_v41 = vpop.f32.mrf.mxu0  ;;  %v882_v43 = vpack.c.bf16 %v875_v39, %v874_v38 }
 0x4e7   :  { %v852_v46 = vadd.f32 %v1197_v41, %v1069_v21 }
 0x4e8   :  { %v843_v45 = vpop.f32.mrf.mxu0  ;;  %1215 = vmatprep.mubr.bf16.mxu1 %v882_v43 }
 0x4e9   :  { %v844_v20 = vadd.f32 %v1069_v21, %v843_v45  ;;  %1216 = vmatmul.mubr.bf16.vlgmr.msra.gmra.mxu1 %v883_v44  ;;  %v872_v52 = vmul.f32 0.2, %v852_v46  ;;  %vm864_vm0 = vcmp.ge.f32.partialorder %v852_v46, 0.0 }
 0x4ea   :  { %v1198_v23 = vpop.f32.mrf.mxu0 }
 0x4eb   :  { %v855_v47 = vadd.f32 %v1198_v23, %v1069_v21  ;;  %v870_v49 = vmul.f32 0.2, %v844_v20  ;;  %vm862_vm15 = vcmp.ge.f32.partialorder %v844_v20, 0.0  ;;  %v880_v7 = vsel %vm864_vm0, %v852_v46, %v872_v52 }
 0x4ec   :  { %v846_v48 = vpop.f32.mrf.mxu0 }
 0x4ed   :  { %vm865_vm14 = vcmp.ge.f32.partialorder %v855_v47, 0.0  ;;  %v873_v50 = vmul.f32 0.2, %v855_v47  ;;  %v847_v28 = vadd.f32 %v1069_v21, %v846_v48  ;;  %v878_v36 = vsel %vm862_vm15, %v844_v20, %v870_v49 }
 0x4ef   :  { %vm863_vm1 = vcmp.ge.f32.partialorder %v847_v28, 0.0  ;;  %v871_v53 = vmul.f32 0.2, %v847_v28  ;;  %v881_v54 = vsel %vm865_vm14, %v855_v47, %v873_v50 }
 0x4f0   :  { %v885_v55 = vpack.c.bf16 %v881_v54, %v880_v7 }
 0x4f1   :  { %v879_v40 = vsel %vm863_vm1, %v847_v28, %v871_v53 }
 0x4f2   :  { %v884_v30 = vpack.c.bf16 %v879_v40, %v878_v36 }
 0x4f4   :  { %1219 = vmatprep.mubr.bf16.mxu1 %v884_v30 }
 0x4f5   :  { %1220 = vmatmul.mubr.bf16.gmra.mxu1 %v885_v55 }
 0x5a9   :  { %v1217_v59 = vpop.f32.mrf.mxu1 }
 0x5aa   :  { %v1000_v60 = vadd.f32 %v1217_v59, %v1078_v56 }
 0x5ab   :  { %v991_v61 = vpop.f32.mrf.mxu1 }
 0x5ac   :  { %v1024_v34 = vadd.f32 %v1000_v60, %v1545_v58  ;;  %v992_v0 = vadd.f32 %v1078_v56, %v991_v61 }
 0x5ad   :  { %v1218_v62 = vpop.f32.mrf.mxu1 }
 0x5ae   :  { %1032 = vst [vmem:[#allocation5 + $0x10] sm:$0xff] %v1024_v34  ;;  %v1022_v8 = vadd.f32 %v992_v0, %v1538_v35  ;;  %v1003_v9 = vadd.f32 %v1218_v62, %v1078_v56 }
 0x5af   :  { %v994_v10 = vpop.f32.mrf.mxu1 }
 0x5b0   :  { %1030 = vst [vmem:[#allocation5] sm:$0xff] %v1022_v8  ;;  %v1025_v2 = vadd.f32 %v1003_v9, %v1550_v63  ;;  %v995_v1 = vadd.f32 %v1078_v56, %v994_v10 }
 0x5b2   :  { %1033 = vst [vmem:[#allocation5 + $0x18] sm:$0xff] %v1025_v2  ;;  %v1023_v11 = vadd.f32 %v995_v1, %v1542_v57 }
 0x5b4   :  { %1031 = vst [vmem:[#allocation5 + $0x8] sm:$0xff] %v1023_v11 }
 0x5b5   :  { %v1221_v15 = vpop.f32.mrf.mxu1 }
 0x5b6   :  { %v1016_v42 = vadd.f32 %v1221_v15, %v1078_v56 }
 0x5b7   :  { %v1007_v17 = vpop.f32.mrf.mxu1 }
 0x5b8   :  { %v1028_v58 = vadd.f32 %v1016_v42, %v1557_v16  ;;  %v1008_v13 = vadd.f32 %v1078_v56, %v1007_v17 }
 0x5b9   :  { %v1222_v27 = vpop.f32.mrf.mxu1 }
 0x5ba   :  { %1036 = vst [vmem:[#allocation5 + $0x30] sm:$0xff] %v1028_v58  ;;  %v1026_v35 = vadd.f32 %v1008_v13, %v1554_v14  ;;  %v1019_v51 = vadd.f32 %v1222_v27, %v1078_v56 }
 0x5bb   :  { %v1010_v3 = vpop.f32.mrf.mxu1 }
 0x5bc   :  { %1034 = vst [vmem:[#allocation5 + $0x20] sm:$0xff] %v1026_v35  ;;  %v1029_v63 = vadd.f32 %v1019_v51, %v1566_v22  ;;  %v1011_v21 = vadd.f32 %v1078_v56, %v1010_v3 }
 0x5be   :  { %1037 = vst [vmem:[#allocation5 + $0x38] sm:$0xff] %v1029_v63  ;;  %v1027_v57 = vadd.f32 %v1011_v21, %v1562_v18 }
 0x5c0   :  { %1035 = vst [vmem:[#allocation5 + $0x28] sm:$0xff] %v1027_v57 }
 0x5c1   :  { %1313 = shalt.err (!%p1310_p9)
}
 0x5c2   :  { %1049 = dma.vmem_to_hbm [thread:$0]  %s1044_s21, 1024, %s1704_s13, [#allocation4], %s1327_s28, %s1327_s28, %s1328_s29  }
 0x5c3   :  { %1324 = dma.done.wait [#allocation4], 1024  }
 0x5c4   :  { %1325 = vsyncadd [#allocation4], 4294966272 }
 0x5c5   :  { %1053 = vsyncpa [#allocation3], 1 }
 0x5c6   :  { %1054 = vsyncpa [#allocation4], 1 }

</bundles_post_ra>
